<compile_context>
chip_gen: v6e
topology: v6e:2x2x1
jax: 0.10.0
libtpu: 0.0.40
codegen_flags: <defaults>
</compile_context>

<pallas_src>
import functools
import math

import jax
import jax.numpy as jnp
from jax.experimental import pallas as pl
from jax.experimental.pallas import tpu as pltpu


def _round_up(x, m):
    return ((x + m - 1) // m) * m


def _conv_bn_relu_kernel(x_ref, w_ref, shift_ref, o_ref, *, n_rows, wp, kh, kw):
    # x_ref:     (1, R_pad, Cin)     f32  zero-padded, row-flattened NHWC image
    # w_ref:     (kh*kw, Cin, CPAD)  bf16 BN-scale-folded weights, Cout padded
    # shift_ref: (1, CPAD)           f32  beta + (bias - mean) * scale, padded
    # o_ref:     (1, n_rows, CPAD)   f32
    acc = None
    for i in range(kh):                       # fully unrolled: kh*kw static taps
        for j in range(kw):
            off = i * wp + j                  # static row shift for this tap
            lhs = x_ref[0, pl.ds(off, n_rows), :].astype(jnp.bfloat16)
            d = jnp.dot(lhs, w_ref[i * kw + j],
                        preferred_element_type=jnp.float32)   # (n_rows, CPAD)
            acc = d if acc is None else acc + d
    y = acc + shift_ref[...]                                   # folded BN + bias
    o_ref[0] = jnp.maximum(y, 0.0).astype(o_ref.dtype)         # ReLU


def conv_bn_relu(x_nchw, conv_w, conv_b, gamma, beta, run_mean, run_var,
                 *, stride=1, padding=1, eps=1e-5):
    """Forward of ConvBnRelu (eval-mode BN).  x_nchw: (N, Cin, H, W) -> NCHW."""
    if stride != 1:
        raise NotImplementedError("Pallas ConvBnRelu kernel supports stride=1 only")
    N, Cin, H, W = x_nchw.shape
    Cout, _, kh, kw = conv_w.shape
    Hp, Wp = H + 2 * padding, W + 2 * padding
    Ho, Wo = Hp - kh + 1, Wp - kw + 1

    CPAD = _round_up(Cout, 128)                  # lane-dense output channels

    # ---- host-side folding: BN scale into weights, bias/mean/beta into shift ----
    scale = gamma / jnp.sqrt(run_var + eps)                          # (Cout,)
    shift = beta + (conv_b - run_mean) * scale                       # (Cout,)
    w_f = jnp.transpose(conv_w, (2, 3, 1, 0)) * scale[None, None, None, :]
    w_f = w_f.reshape(kh * kw, Cin, Cout)
    w_f = jnp.pad(w_f, ((0, 0), (0, 0), (0, CPAD - Cout))).astype(jnp.bfloat16)
    shift_p = jnp.pad(shift, (0, CPAD - Cout)).reshape(1, CPAD).astype(jnp.float32)

    # ---- NHWC + spatial zero pad, flatten rows (no im2col expansion) ----
    x_nhwc = jnp.transpose(x_nchw, (0, 2, 3, 1)).astype(jnp.float32)
    xp = jnp.pad(x_nhwc, ((0, 0), (padding, padding), (padding, padding), (0, 0)))
    x_flat = xp.reshape(N, Hp * Wp, Cin)

    P = Ho * Wp                                  # over-computed rows per image
    P_pad = _round_up(P, 8)
    halo = (kh - 1) * Wp + (kw - 1)
    R_pad = _round_up(P_pad + halo, 8)           # keep every in-kernel read in-bounds
    x_flat = jnp.pad(x_flat, ((0, 0), (0, R_pad - Hp * Wp), (0, 0)))

    kernel = functools.partial(_conv_bn_relu_kernel,
                               n_rows=P_pad, wp=Wp, kh=kh, kw=kw)

    cost = pl.CostEstimate(
        flops=2 * N * kh * kw * P_pad * Cin * CPAD,
        transcendentals=0,
        bytes_accessed=(N * R_pad * Cin * 4            # activations (f32)
                        + kh * kw * Cin * CPAD * 2     # folded weights (bf16)
                        + CPAD * 4                     # shift
                        + N * P_pad * CPAD * 4),       # output (f32)
    )

    out = pl.pallas_call(
        kernel,
        out_shape=jax.ShapeDtypeStruct((N, P_pad, CPAD), jnp.float32),
        grid=(N,),
        in_specs=[
            pl.BlockSpec((1, R_pad, Cin), lambda n: (n, 0, 0)),
            pl.BlockSpec((kh * kw, Cin, CPAD), lambda n: (0, 0, 0)),
            pl.BlockSpec((1, CPAD), lambda n: (0, 0)),
        ],
        out_specs=pl.BlockSpec((1, P_pad, CPAD), lambda n: (n, 0, 0)),
        compiler_params=pltpu.CompilerParams(dimension_semantics=("parallel",)),
        cost_estimate=cost,
    )(x_flat, w_f, shift_p)

    # Drop padded channels, drop wrap-around columns, back to NCHW.
    out = out[:, :P, :Cout].reshape(N, Ho, Wp, Cout)[:, :, :Wo, :]
    return jnp.transpose(out, (0, 3, 1, 2)).astype(x_nchw.dtype)


# --------------------------------------------------------------------------
# Reference (module semantics with BN folded; same bf16 operand rounding as
# the kernel so the comparison isolates kernel correctness).
# --------------------------------------------------------------------------
def reference(x_r, w_folded_r, shift, *, padding):
    y = jax.lax.conv_general_dilated(
        x_r, w_folded_r, window_strides=(1, 1),
        padding=[(padding, padding), (padding, padding)],
        dimension_numbers=("NCHW", "OIHW", "NCHW"),
        precision=jax.lax.Precision.HIGHEST)
    y = y + shift.reshape(1, -1, 1, 1)
    return jnp.maximum(y, 0.0)


if __name__ == "__main__":
    key = jax.random.PRNGKey(0)
    k_x, k_w, k_b, k_g, k_be, k_m, k_v = jax.random.split(key, 7)

    # ConvBnRelu(in_channels=4, out_channels=8, kernel_size=3, stride=1, padding=1)
    N, Cin, H, W = 2, 4, 16, 16
    Cout, kh, kw = 8, 3, 3
    stride, padding = 1, 1
    eps = 1e-5

    x = jax.random.normal(k_x, (N, Cin, H, W), dtype=jnp.float32)

    fan_in = Cin * kh * kw
    bound = 1.0 / math.sqrt(fan_in)
    conv_w = jax.random.uniform(k_w, (Cout, Cin, kh, kw), minval=-bound, maxval=bound)
    conv_b = jax.random.uniform(k_b, (Cout,), minval=-bound, maxval=bound)
    gamma = 1.0 + 0.1 * jax.random.normal(k_g, (Cout,))
    beta = 0.1 * jax.random.normal(k_be, (Cout,))
    run_mean = 0.1 * jax.random.normal(k_m, (Cout,))
    run_var = jnp.abs(1.0 + 0.1 * jax.random.normal(k_v, (Cout,)))

    out = conv_bn_relu(x, conv_w, conv_b, gamma, beta, run_mean, run_var,
                       stride=stride, padding=padding, eps=eps)
    out = jax.block_until_ready(out)
    assert out.shape == (N, Cout, H, W), out.shape

    # Reference with identical precision choices (bf16-rounded operands, f32 math).
    scale = gamma / jnp.sqrt(run_var + eps)
    shift = beta + (conv_b - run_mean) * scale
    w_folded_r = (conv_w * scale[:, None, None, None]
                  ).astype(jnp.bfloat16).astype(jnp.float32)
    x_r = x.astype(jnp.bfloat16).astype(jnp.float32)
    ref = jax.block_until_ready(reference(x_r, w_folded_r, shift, padding=padding))

    max_err = float(jnp.max(jnp.abs(out - ref)))
    assert jnp.allclose(out, ref, atol=2e-3, rtol=2e-3), max_err

    print("KERNEL_OK")
</pallas_src>

<mosaic_0001>
module attributes {stable_mosaic.version = 11 : i64} {
  func.func @_conv_bn_relu_kernel(%arg0: i32, %arg1: memref<1x328x4xf32, #tpu.memory_space<vmem>>, %arg2: memref<9x4x128xbf16, #tpu.memory_space<vmem>>, %arg3: memref<1x128xf32, #tpu.memory_space<vmem>>, %arg4: memref<1x288x128xf32, #tpu.memory_space<vmem>>) attributes {dimension_semantics = [#tpu.dimension_semantics<parallel>], iteration_bounds = array<i64: 2>, scalar_prefetch = 0 : i64, scratch_operands = 0 : i64, tpu.core_type = #tpu.core_type<tc>, window_params = [{transform_indices = @transform_0, window_bounds = array<i64: 1, 328, 4>}, {pipeline_mode = #tpu.pipeline_mode<synchronous>, transform_indices = @transform_1, window_bounds = array<i64: 9, 4, 128>}, {pipeline_mode = #tpu.pipeline_mode<synchronous>, transform_indices = @transform_2, window_bounds = array<i64: 1, 128>}, {transform_indices = @transform_3, window_bounds = array<i64: 1, 288, 128>}]} {
    %c0 = arith.constant 0 : index
    %c0_0 = arith.constant 0 : index
    %c0_1 = arith.constant 0 : index
    %0 = vector.load %arg1[%c0, %c0_0, %c0_1] : memref<1x328x4xf32, #tpu.memory_space<vmem>>, vector<1x288x4xf32>
    %1 = vector.shape_cast %0 : vector<1x288x4xf32> to vector<288x4xf32>
    %2 = arith.truncf %1 : vector<288x4xf32> to vector<288x4xbf16>
    %c0_2 = arith.constant 0 : index
    %c0_3 = arith.constant 0 : index
    %c0_4 = arith.constant 0 : index
    %3 = vector.load %arg2[%c0_2, %c0_3, %c0_4] : memref<9x4x128xbf16, #tpu.memory_space<vmem>>, vector<1x4x128xbf16>
    %4 = vector.shape_cast %3 : vector<1x4x128xbf16> to vector<4x128xbf16>
    %cst = arith.constant dense<0.000000e+00> : vector<288x128xf32>
    %5 = tpu.matmul %2, %4, %cst {dimension_numbers = #tpu.dot_dimension_numbers<[1], [0], [0], [1], [0, 0, 1, 1], [], []>} : vector<288x4xbf16>, vector<4x128xbf16>, vector<288x128xf32> -> vector<288x128xf32>
    %c0_5 = arith.constant 0 : index
    %c1 = arith.constant 1 : index
    %c0_6 = arith.constant 0 : index
    %6 = vector.load %arg1[%c0_5, %c1, %c0_6] : memref<1x328x4xf32, #tpu.memory_space<vmem>>, vector<1x288x4xf32>
    %7 = vector.shape_cast %6 : vector<1x288x4xf32> to vector<288x4xf32>
    %8 = arith.truncf %7 : vector<288x4xf32> to vector<288x4xbf16>
    %c1_7 = arith.constant 1 : index
    %c0_8 = arith.constant 0 : index
    %c0_9 = arith.constant 0 : index
    %9 = vector.load %arg2[%c1_7, %c0_8, %c0_9] : memref<9x4x128xbf16, #tpu.memory_space<vmem>>, vector<1x4x128xbf16>
    %10 = vector.shape_cast %9 : vector<1x4x128xbf16> to vector<4x128xbf16>
    %cst_10 = arith.constant dense<0.000000e+00> : vector<288x128xf32>
    %11 = tpu.matmul %8, %10, %cst_10 {dimension_numbers = #tpu.dot_dimension_numbers<[1], [0], [0], [1], [0, 0, 1, 1], [], []>} : vector<288x4xbf16>, vector<4x128xbf16>, vector<288x128xf32> -> vector<288x128xf32>
    %12 = arith.addf %5, %11 : vector<288x128xf32>
    %c0_11 = arith.constant 0 : index
    %c2 = arith.constant 2 : index
    %c0_12 = arith.constant 0 : index
    %13 = vector.load %arg1[%c0_11, %c2, %c0_12] : memref<1x328x4xf32, #tpu.memory_space<vmem>>, vector<1x288x4xf32>
    %14 = vector.shape_cast %13 : vector<1x288x4xf32> to vector<288x4xf32>
    %15 = arith.truncf %14 : vector<288x4xf32> to vector<288x4xbf16>
    %c2_13 = arith.constant 2 : index
    %c0_14 = arith.constant 0 : index
    %c0_15 = arith.constant 0 : index
    %16 = vector.load %arg2[%c2_13, %c0_14, %c0_15] : memref<9x4x128xbf16, #tpu.memory_space<vmem>>, vector<1x4x128xbf16>
    %17 = vector.shape_cast %16 : vector<1x4x128xbf16> to vector<4x128xbf16>
    %cst_16 = arith.constant dense<0.000000e+00> : vector<288x128xf32>
    %18 = tpu.matmul %15, %17, %cst_16 {dimension_numbers = #tpu.dot_dimension_numbers<[1], [0], [0], [1], [0, 0, 1, 1], [], []>} : vector<288x4xbf16>, vector<4x128xbf16>, vector<288x128xf32> -> vector<288x128xf32>
    %19 = arith.addf %12, %18 : vector<288x128xf32>
    %c0_17 = arith.constant 0 : index
    %c18 = arith.constant 18 : index
    %c0_18 = arith.constant 0 : index
    %20 = vector.load %arg1[%c0_17, %c18, %c0_18] : memref<1x328x4xf32, #tpu.memory_space<vmem>>, vector<1x288x4xf32>
    %21 = vector.shape_cast %20 : vector<1x288x4xf32> to vector<288x4xf32>
    %22 = arith.truncf %21 : vector<288x4xf32> to vector<288x4xbf16>
    %c3 = arith.constant 3 : index
    %c0_19 = arith.constant 0 : index
    %c0_20 = arith.constant 0 : index
    %23 = vector.load %arg2[%c3, %c0_19, %c0_20] : memref<9x4x128xbf16, #tpu.memory_space<vmem>>, vector<1x4x128xbf16>
    %24 = vector.shape_cast %23 : vector<1x4x128xbf16> to vector<4x128xbf16>
    %cst_21 = arith.constant dense<0.000000e+00> : vector<288x128xf32>
    %25 = tpu.matmul %22, %24, %cst_21 {dimension_numbers = #tpu.dot_dimension_numbers<[1], [0], [0], [1], [0, 0, 1, 1], [], []>} : vector<288x4xbf16>, vector<4x128xbf16>, vector<288x128xf32> -> vector<288x128xf32>
    %26 = arith.addf %19, %25 : vector<288x128xf32>
    %c0_22 = arith.constant 0 : index
    %c19 = arith.constant 19 : index
    %c0_23 = arith.constant 0 : index
    %27 = vector.load %arg1[%c0_22, %c19, %c0_23] : memref<1x328x4xf32, #tpu.memory_space<vmem>>, vector<1x288x4xf32>
    %28 = vector.shape_cast %27 : vector<1x288x4xf32> to vector<288x4xf32>
    %29 = arith.truncf %28 : vector<288x4xf32> to vector<288x4xbf16>
    %c4 = arith.constant 4 : index
    %c0_24 = arith.constant 0 : index
    %c0_25 = arith.constant 0 : index
    %30 = vector.load %arg2[%c4, %c0_24, %c0_25] : memref<9x4x128xbf16, #tpu.memory_space<vmem>>, vector<1x4x128xbf16>
    %31 = vector.shape_cast %30 : vector<1x4x128xbf16> to vector<4x128xbf16>
    %cst_26 = arith.constant dense<0.000000e+00> : vector<288x128xf32>
    %32 = tpu.matmul %29, %31, %cst_26 {dimension_numbers = #tpu.dot_dimension_numbers<[1], [0], [0], [1], [0, 0, 1, 1], [], []>} : vector<288x4xbf16>, vector<4x128xbf16>, vector<288x128xf32> -> vector<288x128xf32>
    %33 = arith.addf %26, %32 : vector<288x128xf32>
    %c0_27 = arith.constant 0 : index
    %c20 = arith.constant 20 : index
    %c0_28 = arith.constant 0 : index
    %34 = vector.load %arg1[%c0_27, %c20, %c0_28] : memref<1x328x4xf32, #tpu.memory_space<vmem>>, vector<1x288x4xf32>
    %35 = vector.shape_cast %34 : vector<1x288x4xf32> to vector<288x4xf32>
    %36 = arith.truncf %35 : vector<288x4xf32> to vector<288x4xbf16>
    %c5 = arith.constant 5 : index
    %c0_29 = arith.constant 0 : index
    %c0_30 = arith.constant 0 : index
    %37 = vector.load %arg2[%c5, %c0_29, %c0_30] : memref<9x4x128xbf16, #tpu.memory_space<vmem>>, vector<1x4x128xbf16>
    %38 = vector.shape_cast %37 : vector<1x4x128xbf16> to vector<4x128xbf16>
    %cst_31 = arith.constant dense<0.000000e+00> : vector<288x128xf32>
    %39 = tpu.matmul %36, %38, %cst_31 {dimension_numbers = #tpu.dot_dimension_numbers<[1], [0], [0], [1], [0, 0, 1, 1], [], []>} : vector<288x4xbf16>, vector<4x128xbf16>, vector<288x128xf32> -> vector<288x128xf32>
    %40 = arith.addf %33, %39 : vector<288x128xf32>
    %c0_32 = arith.constant 0 : index
    %c36 = arith.constant 36 : index
    %c0_33 = arith.constant 0 : index
    %41 = vector.load %arg1[%c0_32, %c36, %c0_33] : memref<1x328x4xf32, #tpu.memory_space<vmem>>, vector<1x288x4xf32>
    %42 = vector.shape_cast %41 : vector<1x288x4xf32> to vector<288x4xf32>
    %43 = arith.truncf %42 : vector<288x4xf32> to vector<288x4xbf16>
    %c6 = arith.constant 6 : index
    %c0_34 = arith.constant 0 : index
    %c0_35 = arith.constant 0 : index
    %44 = vector.load %arg2[%c6, %c0_34, %c0_35] : memref<9x4x128xbf16, #tpu.memory_space<vmem>>, vector<1x4x128xbf16>
    %45 = vector.shape_cast %44 : vector<1x4x128xbf16> to vector<4x128xbf16>
    %cst_36 = arith.constant dense<0.000000e+00> : vector<288x128xf32>
    %46 = tpu.matmul %43, %45, %cst_36 {dimension_numbers = #tpu.dot_dimension_numbers<[1], [0], [0], [1], [0, 0, 1, 1], [], []>} : vector<288x4xbf16>, vector<4x128xbf16>, vector<288x128xf32> -> vector<288x128xf32>
    %47 = arith.addf %40, %46 : vector<288x128xf32>
    %c0_37 = arith.constant 0 : index
    %c37 = arith.constant 37 : index
    %c0_38 = arith.constant 0 : index
    %48 = vector.load %arg1[%c0_37, %c37, %c0_38] : memref<1x328x4xf32, #tpu.memory_space<vmem>>, vector<1x288x4xf32>
    %49 = vector.shape_cast %48 : vector<1x288x4xf32> to vector<288x4xf32>
    %50 = arith.truncf %49 : vector<288x4xf32> to vector<288x4xbf16>
    %c7 = arith.constant 7 : index
    %c0_39 = arith.constant 0 : index
    %c0_40 = arith.constant 0 : index
    %51 = vector.load %arg2[%c7, %c0_39, %c0_40] : memref<9x4x128xbf16, #tpu.memory_space<vmem>>, vector<1x4x128xbf16>
    %52 = vector.shape_cast %51 : vector<1x4x128xbf16> to vector<4x128xbf16>
    %cst_41 = arith.constant dense<0.000000e+00> : vector<288x128xf32>
    %53 = tpu.matmul %50, %52, %cst_41 {dimension_numbers = #tpu.dot_dimension_numbers<[1], [0], [0], [1], [0, 0, 1, 1], [], []>} : vector<288x4xbf16>, vector<4x128xbf16>, vector<288x128xf32> -> vector<288x128xf32>
    %54 = arith.addf %47, %53 : vector<288x128xf32>
    %c0_42 = arith.constant 0 : index
    %c38 = arith.constant 38 : index
    %c0_43 = arith.constant 0 : index
    %55 = vector.load %arg1[%c0_42, %c38, %c0_43] : memref<1x328x4xf32, #tpu.memory_space<vmem>>, vector<1x288x4xf32>
    %56 = vector.shape_cast %55 : vector<1x288x4xf32> to vector<288x4xf32>
    %57 = arith.truncf %56 : vector<288x4xf32> to vector<288x4xbf16>
    %c8 = arith.constant 8 : index
    %c0_44 = arith.constant 0 : index
    %c0_45 = arith.constant 0 : index
    %58 = vector.load %arg2[%c8, %c0_44, %c0_45] : memref<9x4x128xbf16, #tpu.memory_space<vmem>>, vector<1x4x128xbf16>
    %59 = vector.shape_cast %58 : vector<1x4x128xbf16> to vector<4x128xbf16>
    %cst_46 = arith.constant dense<0.000000e+00> : vector<288x128xf32>
    %60 = tpu.matmul %57, %59, %cst_46 {dimension_numbers = #tpu.dot_dimension_numbers<[1], [0], [0], [1], [0, 0, 1, 1], [], []>} : vector<288x4xbf16>, vector<4x128xbf16>, vector<288x128xf32> -> vector<288x128xf32>
    %61 = arith.addf %54, %60 : vector<288x128xf32>
    %c0_47 = arith.constant 0 : index
    %c0_48 = arith.constant 0 : index
    %62 = vector.load %arg3[%c0_47, %c0_48] : memref<1x128xf32, #tpu.memory_space<vmem>>, vector<1x128xf32>
    %63 = vector.broadcast %62 : vector<1x128xf32> to vector<288x128xf32>
    %64 = arith.addf %61, %63 : vector<288x128xf32>
    %cst_49 = arith.constant 0.000000e+00 : f32
    %65 = vector.broadcast %cst_49 : f32 to vector<288x128xf32>
    %66 = arith.maximumf %64, %65 : vector<288x128xf32>
    %c0_50 = arith.constant 0 : index
    %c0_51 = arith.constant 0 : index
    %c0_52 = arith.constant 0 : index
    %67 = vector.load %arg4[%c0_50, %c0_51, %c0_52] : memref<1x288x128xf32, #tpu.memory_space<vmem>>, vector<1x288x128xf32>
    %68 = vector.shape_cast %67 : vector<1x288x128xf32> to vector<288x128xf32>
    %69 = vector.shape_cast %66 : vector<288x128xf32> to vector<1x288x128xf32>
    tpu.vector_store %arg4[%c0_50, %c0_51, %c0_52], %69 {strides = array<i32>} : memref<1x288x128xf32, #tpu.memory_space<vmem>>, vector<1x288x128xf32>,
    return
  }
  func.func @transform_0(%arg0: i32) -> (i32, i32, i32) {
    %c0_i32 = arith.constant 0 : i32
    %c0_i32_0 = arith.constant 0 : i32
    %c0_i32_1 = arith.constant 0 : i32
    return %arg0, %c0_i32, %c0_i32_0 : i32, i32, i32
  }
  func.func @transform_1(%arg0: i32) -> (i32, i32, i32) {
    %c0_i32 = arith.constant 0 : i32
    %c0_i32_0 = arith.constant 0 : i32
    %c0_i32_1 = arith.constant 0 : i32
    %c0_i32_2 = arith.constant 0 : i32
    return %c0_i32, %c0_i32_0, %c0_i32_1 : i32, i32, i32
  }
  func.func @transform_2(%arg0: i32) -> (i32, i32) {
    %c0_i32 = arith.constant 0 : i32
    %c0_i32_0 = arith.constant 0 : i32
    %c0_i32_1 = arith.constant 0 : i32
    return %c0_i32, %c0_i32_0 : i32, i32
  }
  func.func @transform_3(%arg0: i32) -> (i32, i32, i32) {
    %c0_i32 = arith.constant 0 : i32
    %c0_i32_0 = arith.constant 0 : i32
    %c0_i32_1 = arith.constant 0 : i32
    return %arg0, %c0_i32, %c0_i32_0 : i32, i32, i32
  }
}

</mosaic_0001>

<bundles_post_ra>
// kernel: tpu_custom_call.1
= control target key start
LH: loop header
LB: loop body
LE: loop exit
PB: predicated region body
PF: predicated region fallthrough
CT: control target
= control target key end

     0   :  { %8 = vsyncpa [#allocation3], 0  ;;  %s5233_s0 = inlined_call_operand.vmem [shape: f32[2,328,4], index: 0, kind: input, shape index: {}]   ;;  %s5234_s1 = inlined_call_operand.vmem [shape: bf16[9,4,128], index: 1, kind: input, shape index: {}]   ;;  %s5235_s2 = inlined_call_operand.vmem [shape: f32[1,128], index: 2, kind: input, shape index: {}]   ;;  %s5236_s3 = inlined_call_operand.hbm [shape: f32[2,288,128], index: 3, kind: output, shape index: {}]  }
   0x1   :  { %10 = vsyncpa [#allocation3 + $0x1], 0  ;;  %s4057_s12 = smov 0   ;;  %s4059_s13 = smov 0  }
   0x2   :  { %s4061_s14 = smov 0   ;;  %s4063_s15 = smov 0  }
   0x3 LB: > { %s4078_s16 = sadd.s32 4294967295, %s4032_s15   ;;  %s3224_s17 = sadd.s32 4294967294, %s4032_s15   ;;  %s4032_s15 = sphi %s4063_s15, %s5242_s15   ;;  %s4028_s14 = sphi %s4061_s14, %s5241_s14   ;;  %s4024_s13 = sphi %s4059_s13, %s5240_s13   ;;  %s4020_s12 = sphi %s4057_s12, %s5239_s12  }
   0x4   : > { %s4082_s18 = sadd.s32 1, %s4032_s15   ;;  %s91_s19 = sadd.s32 1, %s4028_s14 }
   0x5   : > { %s88_s20 = ssub.s32 %s4032_s15, %s4082_s18  ;;  %p101_p0 = scmp.ne.s32.totalorder %s4028_s14, %s4024_s13 }
   0x6   : > { %p89_p1 = scmp.eq.s32.totalorder %s88_s20, 0  ;;  %p102_p2 = scmp.eq.s32.totalorder %s4078_s16, 1 }
   0x7   : > { %p107_p3 = scmp.ne.s32.totalorder %s4024_s13, %s4020_s12  ;;  %p108_p4 = scmp.eq.s32.totalorder %s3224_s17, 1 }
   0x8   : > { %s4093_s21 = scalar_select %p89_p1, %s4028_s14, %s91_s19  }
   0x9   : > { %p4095_p5 = por %p102_p2, %p101_p0  ;;  %p4099_p6 = por %p108_p4, %p107_p3 }
   0xa   : > { %p3227_p7 = scmp.ge.s32.totalorder %s4032_s15, 1  ;;  %p140_p8 = scmp.lt.s32.totalorder %s4032_s15, 3 }
   0xc   : > { %p141_p9 = pnand %p3227_p7, %p140_p8 }
   0xd   : > { %p164_p10 = scmp.lt.s32.totalorder (!%p141_p9), %s4078_s16, 1  ;;  %s161_s29 = sand.u32 (!%p141_p9), 1, %s4024_s13  }
   0xe   : > { %144 = sbr.rel (%p141_p9) target bundleno = 567 (0x237), region = 32  ;;  %s4034_s19 = smov (!%p141_p9), [#allocation2]  }
   0xf   : > { %s3976_s20 = sshll.u32 (!%p141_p9), %s4034_s19, 4  ;;  %s3977_s20 = int_to_ptr.vmem [resolvable:$false] %s3976_s20 }
  0x10   : > { %s3978_s24 = scalar_lea.vmem (!%p141_p9), %s3977_s20, 9216 }
  0x13   : > { %v3229_v0 = vld [vmem:[%s5234_s1 + $0x2] sm:$0x3]  ;;  %vm336_vm0 = vcmask 1041408   ;;  %v3266_v2 = vld [vmem:[%s5234_s1 + $0x4] sm:$0x3]  ;;  %s165_s30 = scalar_select %p164_p10, %s4078_s16, 1 }
  0x14   : > { %3918 = vmatprep.subr.msk.bf16.mxu0 %vm336_vm0, %v3229_v0  ;;  %3919 = vmatprep.subr.msk.bf16.mxu1 %vm336_vm0, %v3229_v0  ;;  %v338_v1 = vsel %vm336_vm0, %v3229_v0, 0  ;;  %v224_v3 = vld [vmem:[%s5234_s1] sm:$0x3]  ;;  %vm281_vm1 = vcmask 31744   ;;  %v862_v15 = vsel %vm336_vm0, %v3266_v2, 0 }
  0x15   : > { %3575 = vmatpush3.bf16.msra.mxu0 %v338_v1  ;;  %3917 = vmatpush3.bf16.msra.mxu1 %v338_v1  ;;  %s3929_s4 = smul.u32 328, %s165_s30  ;;  %v572_v18 = vsel %vm336_vm0, %v224_v3, 0  ;;  %v4146_v24 = vld [vmem:[%s5234_s1 + $0x6] sm:$0x3]  ;;  %v4151_v25 = vld [vmem:[%s5234_s1 + $0x8] sm:$0x3] }
  0x16   : > { %3921 = vmatprep.subr.msk.bf16.mxu0 %vm336_vm0, %v3266_v2  ;;  %3920 = vmatprep.subr.msk.bf16.mxu1 %vm336_vm0, %v224_v3  ;;  %s3928_s30 = smul.u32 288, %s161_s29 }
  0x17   : > { %s4124_s7 = scalar_lea.vmem %s5233_s0, %s3929_s4 }
  0x18   : > { %v225_v4 = vld [vmem:[%s4124_s7 + $0x1] sm:$0xff]  ;;  %v226_v5 = vld [vmem:[%s4124_s7 + $0x9] sm:$0xff]  ;;  %v227_v9 = vld [vmem:[%s4124_s7 + $0x11] sm:$0xff]  ;;  %s5079_s6 = scalar_lea.vmem [#allocation2], %s3928_s30 }
  0x19   : > { %v245_v6 = vld [vmem:[%s4124_s7 + $0xa1] sm:$0xff]  ;;  %v261_v7 = vpack.c.bf16 %v226_v5, %v225_v4  ;;  %v246_v8 = vld [vmem:[%s4124_s7 + $0xa9] sm:$0xff]  ;;  %v228_v10 = vld [vmem:[%s4124_s7 + $0x19] sm:$0xff]  ;;  %s3162_s8 = sshll.u32 %s5079_s6, 4  ;;  %s5187_s8 = int_to_ptr.vmem [resolvable:$true] %s3162_s8 }
  0x1a   : > { %v271_v11 = vpack.c.bf16 %v246_v8, %v245_v6  ;;  %v262_v12 = vpack.c.bf16 %v228_v10, %v227_v9  ;;  %v247_v13 = vld [vmem:[%s4124_s7 + $0xb1] sm:$0xff]  ;;  %v248_v14 = vld [vmem:[%s4124_s7 + $0xb9] sm:$0xff]  ;;  %v229_v16 = vld [vmem:[%s4124_s7 + $0x21] sm:$0xff]  ;;  %v1188_v10 = vsel %vm336_vm0, %v4146_v24, 0  ;;  %s3972_s17 = scalar_lea.vmem %s5187_s8, 4608  ;;  %p3979_p0 = scmp.lt.s32.totalorder %s5187_s8, %s3977_s20 }
  0x1b   : > { %3576 = vmatprep.mubr.msk.bf16.mxu0 %vm281_vm1, %v261_v7  ;;  %v272_v17 = vpack.c.bf16 %v248_v14, %v247_v13  ;;  %v230_v19 = vld [vmem:[%s4124_s7 + $0x29] sm:$0xff]  ;;  %v249_v20 = vld [vmem:[%s4124_s7 + $0xc1] sm:$0xff]  ;;  %v231_v26 = vld [vmem:[%s4124_s7 + $0x31] sm:$0xff]  ;;  %p3973_p11 = scmp.ne.s32.totalorder %s5187_s8, %s3972_s17  ;;  %p3980_p1 = scmp.lt.s32.totalorder %s3978_s24, %s3972_s17 }
  0x1c   : > { %v250_v21 = vld [vmem:[%s4124_s7 + $0xc9] sm:$0xff]  ;;  %3596 = vmatprep.mubr.msk.bf16.mxu1 %vm281_vm1, %v271_v11  ;;  %3577 = vmatmul.mubr.msk.bf16.vlgmr.msra.gmra.mxu0 %vm281_vm1, %v262_v12  ;;  %v263_v22 = vpack.c.bf16 %v230_v19, %v229_v16  ;;  %v232_v27 = vld [vmem:[%s4124_s7 + $0x39] sm:$0xff]  ;;  %v251_v28 = vld [vmem:[%s4124_s7 + $0xd1] sm:$0xff] }
  0x1d   : > { %v273_v23 = vpack.c.bf16 %v250_v21, %v249_v20  ;;  %3597 = vmatmul.mubr.msk.bf16.vlgmr.msra.gmra.mxu1 %vm281_vm1, %v272_v17  ;;  %3651 = vmatpush3.bf16.msra.mxu0 %v862_v15  ;;  %v252_v29 = vld [vmem:[%s4124_s7 + $0xd9] sm:$0xff]  ;;  %v233_v30 = vld [vmem:[%s4124_s7 + $0x41] sm:$0xff]  ;;  %v234_v31 = vld [vmem:[%s4124_s7 + $0x49] sm:$0xff]  ;;  %v264_v34 = vpack.c.bf16 %v232_v27, %v231_v26  ;;  %p3974_p12 = pnand %p3973_p11, %p4095_p5  ;;  %p3981_p2 = por %p3980_p1, %p3979_p0 }
  0x1e   : > { %3613 = vmatpush3.bf16.msra.mxu1 %v572_v18  ;;  %3580 = vmatprep.mubr.msk.bf16.mxu0 %vm281_vm1, %v263_v22  ;;  %v253_v32 = vld [vmem:[%s4124_s7 + $0xe1] sm:$0xff]  ;;  %v254_v33 = vld [vmem:[%s4124_s7 + $0xe9] sm:$0xff]  ;;  %v274_v35 = vpack.c.bf16 %v252_v29, %v251_v28  ;;  %v265_v36 = vpack.c.bf16 %v234_v31, %v233_v30  ;;  %v235_v38 = vld [vmem:[%s4124_s7 + $0x51] sm:$0xff]  ;;  %v1514_v22 = vsel %vm336_vm0, %v4151_v25, 0 }
  0x1f   : > { %3600 = vmatprep.mubr.msk.bf16.mxu1 %vm281_vm1, %v273_v23  ;;  %3922 = vmatprep.subr.msk.bf16.mxu1 %vm336_vm0, %v4146_v24  ;;  %v275_v37 = vpack.c.bf16 %v254_v33, %v253_v32  ;;  %v236_v39 = vld [vmem:[%s4124_s7 + $0x59] sm:$0xff]  ;;  %v255_v40 = vld [vmem:[%s4124_s7 + $0xf1] sm:$0xff]  ;;  %v237_v42 = vld [vmem:[%s4124_s7 + $0x61] sm:$0xff]  ;;  %p3975_p13 = pneg %p3974_p12 }
  0x20   : > { %3923 = vmatprep.subr.msk.bf16.mxu0 %vm336_vm0, %v4151_v25  ;;  %v256_v41 = vld [vmem:[%s4124_s7 + $0xf9] sm:$0xff]  ;;  %v238_v43 = vld [vmem:[%s4124_s7 + $0x69] sm:$0xff]  ;;  %v257_v44 = vld [vmem:[%s4124_s7 + $0x101] sm:$0xff]  ;;  %v266_v46 = vpack.c.bf16 %v236_v39, %v235_v38 }
  0x21   : > { %v258_v45 = vld [vmem:[%s4124_s7 + $0x109] sm:$0xff]  ;;  %v276_v47 = vpack.c.bf16 %v256_v41, %v255_v40  ;;  %v267_v48 = vpack.c.bf16 %v238_v43, %v237_v42  ;;  %v239_v50 = vld [vmem:[%s4124_s7 + $0x71] sm:$0xff]  ;;  %v240_v51 = vld [vmem:[%s4124_s7 + $0x79] sm:$0xff]  ;;  %p3982_p3 = pnand %p3981_p2, %p3975_p13 }
  0x22   : > { %v277_v49 = vpack.c.bf16 %v258_v45, %v257_v44  ;;  %v259_v52 = vld [vmem:[%s4124_s7 + $0x111] sm:$0xff]  ;;  %v260_v53 = vld [vmem:[%s4124_s7 + $0x119] sm:$0xff]  ;;  %v241_v54 = vld [vmem:[%s4124_s7 + $0x81] sm:$0xff]  ;;  %v268_v58 = vpack.c.bf16 %v240_v51, %v239_v50 }
  0x23   : > { %v242_v55 = vld [vmem:[%s4124_s7 + $0x89] sm:$0xff]  ;;  %v170_v56 = vld [vmem:[%s4124_s7] sm:$0xff]  ;;  %v278_v59 = vpack.c.bf16 %v260_v53, %v259_v52  ;;  %v243_v62 = vld [vmem:[%s4124_s7 + $0x91] sm:$0xff] }
  0x24   : > { %3581 = vmatmul.mubr.msk.bf16.gmra.mxu0 %vm281_vm1, %v264_v34  ;;  %v171_v57 = vld [vmem:[%s4124_s7 + $0x8] sm:$0xff]  ;;  %v269_v60 = vpack.c.bf16 %v242_v55, %v241_v54  ;;  %v244_v63 = vld [vmem:[%s4124_s7 + $0x99] sm:$0xff]  ;;  %v172_v0 = vld [vmem:[%s4124_s7 + $0x10] sm:$0xff] }
  0x25   : > { %3601 = vmatmul.mubr.msk.bf16.gmra.mxu1 %vm281_vm1, %v274_v35  ;;  %3584 = vmatprep.mubr.msk.bf16.mxu0 %vm281_vm1, %v265_v36  ;;  %v206_v61 = vpack.c.bf16 %v171_v57, %v170_v56  ;;  %v173_v1 = vld [vmem:[%s4124_s7 + $0x18] sm:$0xff]  ;;  %v751_v2 = vld [vmem:[%s4124_s7 + $0x2] sm:$0xff]  ;;  %v752_v3 = vld [vmem:[%s4124_s7 + $0xa] sm:$0xff]  ;;  %v270_v6 = vpack.c.bf16 %v244_v63, %v243_v62 }
  0x26   : > { %3604 = vmatprep.mubr.msk.bf16.mxu1 %vm281_vm1, %v275_v37  ;;  %v174_v4 = vld [vmem:[%s4124_s7 + $0x20] sm:$0xff]  ;;  %v175_v5 = vld [vmem:[%s4124_s7 + $0x28] sm:$0xff]  ;;  %v207_v7 = vpack.c.bf16 %v173_v1, %v172_v0  ;;  %v787_v8 = vpack.c.bf16 %v752_v3, %v751_v2  ;;  %v753_v12 = vld [vmem:[%s4124_s7 + $0x12] sm:$0xff] }
  0x27   : > { %v208_v9 = vpack.c.bf16 %v175_v5, %v174_v4  ;;  %v4210_v11 = vld [vmem:[%s5234_s1 + $0xa] sm:$0x3]  ;;  %v754_v13 = vld [vmem:[%s4124_s7 + $0x1a] sm:$0xff]  ;;  %v176_v14 = vld [vmem:[%s4124_s7 + $0x30] sm:$0xff] }
  0x28   : > { %v177_v15 = vld [vmem:[%s4124_s7 + $0x38] sm:$0xff]  ;;  %v178_v16 = vld [vmem:[%s4124_s7 + $0x40] sm:$0xff]  ;;  %v179_v17 = vld [vmem:[%s4124_s7 + $0x48] sm:$0xff]  ;;  %v4225_v20 = vpack.c.bf16 %v754_v13, %v753_v12 }
  0x29   : > { %v755_v18 = vld [vmem:[%s4124_s7 + $0x22] sm:$0xff]  ;;  %v756_v19 = vld [vmem:[%s4124_s7 + $0x2a] sm:$0xff]  ;;  %v209_v21 = vpack.c.bf16 %v177_v15, %v176_v14  ;;  %v210_v23 = vpack.c.bf16 %v179_v17, %v178_v16  ;;  %v757_v28 = vld [vmem:[%s4124_s7 + $0x32] sm:$0xff] }
  0x2a   : > { %v4229_v24 = vpack.c.bf16 %v756_v19, %v755_v18  ;;  %v4236_v26 = vld [vmem:[%s5234_s1 + $0xc] sm:$0x3]  ;;  %v180_v27 = vld [vmem:[%s4124_s7 + $0x50] sm:$0xff]  ;;  %v758_v29 = vld [vmem:[%s4124_s7 + $0x3a] sm:$0xff] }
  0x2b   : > { %v181_v25 = vld [vmem:[%s4124_s7 + $0x58] sm:$0xff]  ;;  %v759_v30 = vld [vmem:[%s4124_s7 + $0x42] sm:$0xff]  ;;  %v760_v31 = vld [vmem:[%s4124_s7 + $0x4a] sm:$0xff]  ;;  %v4252_v34 = vpack.c.bf16 %v758_v29, %v757_v28 }
  0x2c   : > { %3585 = vmatmul.mubr.msk.bf16.gmra.mxu0 %vm281_vm1, %v266_v46  ;;  %v182_v32 = vld [vmem:[%s4124_s7 + $0x60] sm:$0xff]  ;;  %v183_v33 = vld [vmem:[%s4124_s7 + $0x68] sm:$0xff]  ;;  %v211_v35 = vpack.c.bf16 %v181_v25, %v180_v27  ;;  %v4254_v36 = vpack.c.bf16 %v760_v31, %v759_v30  ;;  %v184_v38 = vld [vmem:[%s4124_s7 + $0x70] sm:$0xff] }
  0x2d   : > { %3605 = vmatmul.mubr.msk.bf16.gmra.mxu1 %vm281_vm1, %v276_v47  ;;  %3588 = vmatprep.mubr.msk.bf16.mxu0 %vm281_vm1, %v267_v48  ;;  %v212_v37 = vpack.c.bf16 %v183_v33, %v182_v32  ;;  %v761_v39 = vld [vmem:[%s4124_s7 + $0x52] sm:$0xff]  ;;  %v762_v40 = vld [vmem:[%s4124_s7 + $0x5a] sm:$0xff]  ;;  %v763_v42 = vld [vmem:[%s4124_s7 + $0x62] sm:$0xff] }
  0x2e   : > { %3608 = vmatprep.mubr.msk.bf16.mxu1 %vm281_vm1, %v277_v49  ;;  %v185_v41 = vld [vmem:[%s4124_s7 + $0x78] sm:$0xff]  ;;  %v764_v43 = vld [vmem:[%s4124_s7 + $0x6a] sm:$0xff]  ;;  %v186_v44 = vld [vmem:[%s4124_s7 + $0x80] sm:$0xff]  ;;  %v4270_v46 = vpack.c.bf16 %v762_v40, %v761_v39 }
  0x2f   : > { %v187_v45 = vld [vmem:[%s4124_s7 + $0x88] sm:$0xff]  ;;  %v213_v47 = vpack.c.bf16 %v185_v41, %v184_v38  ;;  %v4272_v48 = vpack.c.bf16 %v764_v43, %v763_v42  ;;  %v188_v50 = vld [vmem:[%s4124_s7 + $0x90] sm:$0xff]  ;;  %v766_v52 = vld [vmem:[%s4124_s7 + $0x7a] sm:$0xff] }
  0x30   : > { %v214_v49 = vpack.c.bf16 %v187_v45, %v186_v44  ;;  %v765_v51 = vld [vmem:[%s4124_s7 + $0x72] sm:$0xff]  ;;  %v767_v54 = vld [vmem:[%s4124_s7 + $0x82] sm:$0xff]  ;;  %v768_v55 = vld [vmem:[%s4124_s7 + $0x8a] sm:$0xff] }
  0x31   : > { %v189_v53 = vld [vmem:[%s4124_s7 + $0x98] sm:$0xff]  ;;  %v190_v56 = vld [vmem:[%s4124_s7 + $0xa0] sm:$0xff]  ;;  %v191_v57 = vld [vmem:[%s4124_s7 + $0xa8] sm:$0xff] }
  0x32   : > { %v192_v62 = vld [vmem:[%s4124_s7 + $0xb0] sm:$0xff]  ;;  %v770_v0 = vld [vmem:[%s4124_s7 + $0x9a] sm:$0xff]  ;;  %v771_v2 = vld [vmem:[%s4124_s7 + $0xa2] sm:$0xff] }
  0x33   : > { %v769_v63 = vld [vmem:[%s4124_s7 + $0x92] sm:$0xff]  ;;  %v772_v3 = vld [vmem:[%s4124_s7 + $0xaa] sm:$0xff]  ;;  %v194_v4 = vld [vmem:[%s4124_s7 + $0xc0] sm:$0xff] }
  0x34   : > { %3589 = vmatmul.mubr.msk.bf16.gmra.mxu0 %vm281_vm1, %v268_v58  ;;  %v4288_v58 = vpack.c.bf16 %v766_v52, %v765_v51  ;;  %v193_v1 = vld [vmem:[%s4124_s7 + $0xb8] sm:$0xff]  ;;  %v195_v5 = vld [vmem:[%s4124_s7 + $0xc8] sm:$0xff]  ;;  %v198_v17 = vld [vmem:[%s4124_s7 + $0xe0] sm:$0xff] }
  0x35   : > { %3609 = vmatmul.mubr.msk.bf16.gmra.mxu1 %vm281_vm1, %v278_v59  ;;  %3592 = vmatprep.mubr.msk.bf16.mxu0 %vm281_vm1, %v269_v60  ;;  %v215_v59 = vpack.c.bf16 %v189_v53, %v188_v50  ;;  %v4290_v60 = vpack.c.bf16 %v768_v55, %v767_v54  ;;  %v773_v12 = vld [vmem:[%s4124_s7 + $0xb2] sm:$0xff]  ;;  %v774_v13 = vld [vmem:[%s4124_s7 + $0xba] sm:$0xff]  ;;  %v775_v15 = vld [vmem:[%s4124_s7 + $0xc2] sm:$0xff] }
  0x36   : > { %3614 = vmatprep.mubr.msk.bf16.mxu1 %vm281_vm1, %v206_v61  ;;  %v216_v61 = vpack.c.bf16 %v191_v57, %v190_v56  ;;  %v197_v14 = vld [vmem:[%s4124_s7 + $0xd8] sm:$0xff]  ;;  %v776_v16 = vld [vmem:[%s4124_s7 + $0xca] sm:$0xff]  ;;  %v4324_v19 = vpack.c.bf16 %v774_v13, %v773_v12  ;;  %v779_v30 = vld [vmem:[%s4124_s7 + $0xe2] sm:$0xff]  ;;  %v1840_v57 = vsel %vm336_vm0, %v4210_v11, 0 }
  0x37   : > { %v199_v18 = vld [vmem:[%s4124_s7 + $0xe8] sm:$0xff]  ;;  %v200_v27 = vld [vmem:[%s4124_s7 + $0xf0] sm:$0xff]  ;;  %v778_v29 = vld [vmem:[%s4124_s7 + $0xda] sm:$0xff] }
  0x38   : > { %v777_v28 = vld [vmem:[%s4124_s7 + $0xd2] sm:$0xff]  ;;  %v780_v31 = vld [vmem:[%s4124_s7 + $0xea] sm:$0xff]  ;;  %v202_v32 = vld [vmem:[%s4124_s7 + $0x100] sm:$0xff] }
  0x39   : > { %v201_v25 = vld [vmem:[%s4124_s7 + $0xf8] sm:$0xff]  ;;  %v203_v33 = vld [vmem:[%s4124_s7 + $0x108] sm:$0xff]  ;;  %v4344_v38 = vpack.c.bf16 %v780_v31, %v779_v30  ;;  %v204_v40 = vld [vmem:[%s4124_s7 + $0x110] sm:$0xff] }
  0x3a   : > { %v222_v39 = vpack.c.bf16 %v203_v33, %v202_v32  ;;  %v781_v41 = vld [vmem:[%s4124_s7 + $0xf2] sm:$0xff]  ;;  %v782_v42 = vld [vmem:[%s4124_s7 + $0xfa] sm:$0xff]  ;;  %v783_v44 = vld [vmem:[%s4124_s7 + $0x102] sm:$0xff] }
  0x3b   : > { %v205_v43 = vld [vmem:[%s4124_s7 + $0x118] sm:$0xff]  ;;  %v784_v45 = vld [vmem:[%s4124_s7 + $0x10a] sm:$0xff] }
  0x3c   : > { %3593 = vmatmul.mubr.msk.bf16.gmra.mxu0 %vm281_vm1, %v270_v6  ;;  %v4306_v6 = vpack.c.bf16 %v770_v0, %v769_v63  ;;  %v4360_v50 = vpack.c.bf16 %v784_v45, %v783_v44  ;;  %v785_v51 = vld [vmem:[%s4124_s7 + $0x112] sm:$0xff]  ;;  %v786_v52 = vld [vmem:[%s4124_s7 + $0x11a] sm:$0xff] }
  0x3d   : > { %3615 = vmatmul.mubr.msk.bf16.vlgmr.msra.gmra.mxu1 %vm281_vm1, %v207_v7  ;;  %3652 = vmatprep.mubr.msk.bf16.mxu0 %vm281_vm1, %v787_v8  ;;  %v217_v7 = vpack.c.bf16 %v193_v1, %v192_v62  ;;  %v4308_v8 = vpack.c.bf16 %v772_v3, %v771_v2  ;;  %v1403_v53 = vld [vmem:[%s4124_s7 + $0x13] sm:$0xff]  ;;  %v1404_v54 = vld [vmem:[%s4124_s7 + $0x1b] sm:$0xff]  ;;  %v4373_v55 = vpack.c.bf16 %v786_v52, %v785_v51  ;;  %v4401_v1 = vld [vmem:[%s5234_s1 + $0x10] sm:$0x3] }
  0x3e   : > { %3689 = vmatpush3.bf16.msra.mxu1 %v1188_v10  ;;  %3618 = vmatprep.mubr.msk.bf16.mxu1 %vm281_vm1, %v208_v9  ;;  %v218_v9 = vpack.c.bf16 %v195_v5, %v194_v4  ;;  %v196_v10 = vld [vmem:[%s4124_s7 + $0xd0] sm:$0xff]  ;;  %v1439_v56 = vpack.c.bf16 %v1404_v54, %v1403_v53  ;;  %v1408_v62 = vld [vmem:[%s4124_s7 + $0x3b] sm:$0xff]  ;;  %v1437_v51 = vld [vmem:[%s4124_s7 + $0x123] sm:$0xff] }
  0x3f   : > { %3924 = vmatprep.subr.msk.bf16.mxu1 %vm336_vm0, %v4210_v11  ;;  %v1407_v11 = vld [vmem:[%s4124_s7 + $0x33] sm:$0xff]  ;;  %v1410_v2 = vld [vmem:[%s4124_s7 + $0x4b] sm:$0xff]  ;;  %v1412_v3 = vld [vmem:[%s4124_s7 + $0x5b] sm:$0xff] }
  0x40   : > { %v1441_v0 = vpack.c.bf16 %v1408_v62, %v1407_v11  ;;  %v1418_v13 = vld [vmem:[%s4124_s7 + $0x8b] sm:$0xff]  ;;  %v1431_v31 = vld [vmem:[%s4124_s7 + $0xf3] sm:$0xff]  ;;  %v1432_v32 = vld [vmem:[%s4124_s7 + $0xfb] sm:$0xff] }
  0x41   : > { %v1430_v30 = vld [vmem:[%s4124_s7 + $0xeb] sm:$0xff]  ;;  %v1730_v44 = vld [vmem:[%s4124_s7 + $0x1c] sm:$0xff] }
  0x42   : > { %v1438_v52 = vld [vmem:[%s4124_s7 + $0x12b] sm:$0xff] }
  0x43   : > { %v1731_v53 = vld [vmem:[%s4124_s7 + $0x24] sm:$0xff]  ;;  %v1732_v54 = vld [vmem:[%s4124_s7 + $0x2c] sm:$0xff] }
  0x44   : > { %3653 = vmatmul.mubr.msk.bf16.vlgmr.msra.gmra.mxu0 %vm281_vm1, %v4225_v20  ;;  %v1735_v62 = vld [vmem:[%s4124_s7 + $0x44] sm:$0xff] }
  0x45   : > { %3619 = vmatmul.mubr.msk.bf16.gmra.mxu1 %vm281_vm1, %v209_v21  ;;  %3727 = vmatpush3.bf16.msra.mxu0 %v1514_v22  ;;  %v219_v21 = vpack.c.bf16 %v197_v14, %v196_v10  ;;  %v4326_v22 = vpack.c.bf16 %v776_v16, %v775_v15  ;;  %v1420_v14 = vld [vmem:[%s4124_s7 + $0x9b] sm:$0xff] }
  0x46   : > { %3622 = vmatprep.mubr.msk.bf16.mxu1 %vm281_vm1, %v210_v23  ;;  %3656 = vmatprep.mubr.msk.bf16.mxu0 %vm281_vm1, %v4229_v24  ;;  %v220_v23 = vpack.c.bf16 %v199_v18, %v198_v17  ;;  %v1422_v17 = vld [vmem:[%s4124_s7 + $0xab] sm:$0xff]  ;;  %v1424_v18 = vld [vmem:[%s4124_s7 + $0xbb] sm:$0xff] }
  0x47   : > { %3925 = vmatprep.subr.msk.bf16.mxu0 %vm336_vm0, %v4236_v26 }
  0x4c   : > { %3657 = vmatmul.mubr.msk.bf16.gmra.mxu0 %vm281_vm1, %v4252_v34 }
  0x4d   : > { %3623 = vmatmul.mubr.msk.bf16.gmra.mxu1 %vm281_vm1, %v211_v35  ;;  %3660 = vmatprep.mubr.msk.bf16.mxu0 %vm281_vm1, %v4254_v36  ;;  %v4342_v35 = vpack.c.bf16 %v778_v29, %v777_v28  ;;  %v1428_v28 = vld [vmem:[%s4124_s7 + $0xdb] sm:$0xff] }
  0x4e   : > { %3626 = vmatprep.mubr.msk.bf16.mxu1 %vm281_vm1, %v212_v37  ;;  %v221_v37 = vpack.c.bf16 %v201_v25, %v200_v27  ;;  %v1426_v27 = vld [vmem:[%s4124_s7 + $0xcb] sm:$0xff] }
  0x54   : > { %3661 = vmatmul.mubr.msk.bf16.gmra.mxu0 %vm281_vm1, %v4270_v46 }
  0x55   : > { %3627 = vmatmul.mubr.msk.bf16.gmra.mxu1 %vm281_vm1, %v213_v47  ;;  %3664 = vmatprep.mubr.msk.bf16.mxu0 %vm281_vm1, %v4272_v48  ;;  %v4358_v47 = vpack.c.bf16 %v782_v42, %v781_v41  ;;  %v1435_v41 = vld [vmem:[%s4124_s7 + $0x113] sm:$0xff]  ;;  %v1436_v42 = vld [vmem:[%s4124_s7 + $0x11b] sm:$0xff] }
  0x56   : > { %3630 = vmatprep.mubr.msk.bf16.mxu1 %vm281_vm1, %v214_v49  ;;  %v223_v49 = vpack.c.bf16 %v205_v43, %v204_v40  ;;  %v1112_v40 = vld [vmem:[%s4124_s7 + $0x12a] sm:$0xff]  ;;  %v1729_v43 = vld [vmem:[%s4124_s7 + $0x14] sm:$0xff] }
  0x5c   : > { %3665 = vmatmul.mubr.msk.bf16.gmra.mxu0 %vm281_vm1, %v4288_v58 }
  0x5d   : > { %3631 = vmatmul.mubr.msk.bf16.gmra.mxu1 %vm281_vm1, %v215_v59  ;;  %3668 = vmatprep.mubr.msk.bf16.mxu0 %vm281_vm1, %v4290_v60  ;;  %v4382_v59 = vld [vmem:[%s5234_s1 + $0xe] sm:$0x3] }
  0x5e   : > { %3634 = vmatprep.mubr.msk.bf16.mxu1 %vm281_vm1, %v216_v61  ;;  %v1406_v61 = vld [vmem:[%s4124_s7 + $0x2b] sm:$0xff]  ;;  %v2492_v11 = vsel %vm336_vm0, %v4382_v59, 0 }
  0x64   : > { %3669 = vmatmul.mubr.msk.bf16.gmra.mxu0 %vm281_vm1, %v4306_v6 }
  0x65   : > { %3635 = vmatmul.mubr.msk.bf16.gmra.mxu1 %vm281_vm1, %v217_v7  ;;  %3672 = vmatprep.mubr.msk.bf16.mxu0 %vm281_vm1, %v4308_v8  ;;  %v1415_v7 = vld [vmem:[%s4124_s7 + $0x73] sm:$0xff] }
  0x66   : > { %3638 = vmatprep.mubr.msk.bf16.mxu1 %vm281_vm1, %v218_v9  ;;  %v1416_v9 = vld [vmem:[%s4124_s7 + $0x7b] sm:$0xff] }
  0x67   : > { %v1445_v12 = vpack.c.bf16 %v1416_v9, %v1415_v7 }
  0x6c   : > { %3673 = vmatmul.mubr.msk.bf16.gmra.mxu0 %vm281_vm1, %v4324_v19 }
  0x6d   : > { %3639 = vmatmul.mubr.msk.bf16.gmra.mxu1 %vm281_vm1, %v219_v21  ;;  %3676 = vmatprep.mubr.msk.bf16.mxu0 %vm281_vm1, %v4326_v22 }
  0x6e   : > { %3642 = vmatprep.mubr.msk.bf16.mxu1 %vm281_vm1, %v220_v23 }
  0x74   : > { %3677 = vmatmul.mubr.msk.bf16.gmra.mxu0 %vm281_vm1, %v4342_v35 }
  0x75   : > { %3643 = vmatmul.mubr.msk.bf16.gmra.mxu1 %vm281_vm1, %v221_v37  ;;  %3680 = vmatprep.mubr.msk.bf16.mxu0 %vm281_vm1, %v4344_v38  ;;  %v1111_v37 = vld [vmem:[%s4124_s7 + $0x122] sm:$0xff] }
  0x76   : > { %3646 = vmatprep.mubr.msk.bf16.mxu1 %vm281_vm1, %v222_v39  ;;  %v1434_v39 = vld [vmem:[%s4124_s7 + $0x10b] sm:$0xff] }
  0x7c   : > { %3681 = vmatmul.mubr.msk.bf16.gmra.mxu0 %vm281_vm1, %v4358_v47 }
  0x7d   : > { %3647 = vmatmul.mubr.msk.bf16.gmra.mxu1 %vm281_vm1, %v223_v49  ;;  %3684 = vmatprep.mubr.msk.bf16.mxu0 %vm281_vm1, %v4360_v50  ;;  %v1455_v49 = vpack.c.bf16 %v1436_v42, %v1435_v41  ;;  %v1753_v42 = vld [vmem:[%s4124_s7 + $0xd4] sm:$0xff] }
  0x7e   : > { %3690 = vmatprep.mubr.msk.bf16.mxu1 %vm281_vm1, %v4225_v20  ;;  %v1405_v20 = vld [vmem:[%s4124_s7 + $0x23] sm:$0xff] }
  0x7f   : > { %v1440_v63 = vpack.c.bf16 %v1406_v61, %v1405_v20  ;;  %v1766_v20 = vpack.c.bf16 %v1732_v54, %v1731_v53 }
  0x84   : > { %3685 = vmatmul.mubr.msk.bf16.gmra.mxu0 %vm281_vm1, %v4373_v55 }
  0x85   : > { %3691 = vmatmul.mubr.msk.bf16.vlgmr.msra.gmra.mxu1 %vm281_vm1, %v4229_v24  ;;  %3728 = vmatprep.mubr.msk.bf16.mxu0 %vm281_vm1, %v1439_v56  ;;  %v2166_v24 = vsel %vm336_vm0, %v4236_v26, 0  ;;  %v1411_v26 = vld [vmem:[%s4124_s7 + $0x53] sm:$0xff]  ;;  %v1734_v56 = vld [vmem:[%s4124_s7 + $0x3c] sm:$0xff] }
  0x86   : > { %3765 = vmatpush3.bf16.msra.mxu1 %v1840_v57  ;;  %3694 = vmatprep.mubr.msk.bf16.mxu1 %vm281_vm1, %v4252_v34  ;;  %v1409_v34 = vld [vmem:[%s4124_s7 + $0x43] sm:$0xff]  ;;  %v1443_v5 = vpack.c.bf16 %v1412_v3, %v1411_v26  ;;  %v1456_v57 = vpack.c.bf16 %v1438_v52, %v1437_v51  ;;  %v1740_v3 = vld [vmem:[%s4124_s7 + $0x6c] sm:$0xff] }
  0x87   : > { %3926 = vmatprep.subr.msk.bf16.mxu1 %vm336_vm0, %v4382_v59  ;;  %v1442_v4 = vpack.c.bf16 %v1410_v2, %v1409_v34  ;;  %v2818_v59 = vsel %vm336_vm0, %v4401_v1, 0  ;;  %v1739_v26 = vld [vmem:[%s4124_s7 + $0x64] sm:$0xff] }
  0x8c   : > { %3729 = vmatmul.mubr.msk.bf16.vlgmr.msra.gmra.mxu0 %vm281_vm1, %v1440_v63  ;;  %v1736_v63 = vld [vmem:[%s4124_s7 + $0x4c] sm:$0xff] }
  0x8d   : > { %3695 = vmatmul.mubr.msk.bf16.gmra.mxu1 %vm281_vm1, %v4254_v36  ;;  %3803 = vmatpush3.bf16.msra.mxu0 %v2166_v24  ;;  %v1413_v36 = vld [vmem:[%s4124_s7 + $0x63] sm:$0xff]  ;;  %v1737_v24 = vld [vmem:[%s4124_s7 + $0x54] sm:$0xff]  ;;  %v1768_v34 = vpack.c.bf16 %v1736_v63, %v1735_v62 }
  0x8e   : > { %3698 = vmatprep.mubr.msk.bf16.mxu1 %vm281_vm1, %v4270_v46  ;;  %3732 = vmatprep.mubr.msk.bf16.mxu0 %vm281_vm1, %v1441_v0  ;;  %v1414_v46 = vld [vmem:[%s4124_s7 + $0x6b] sm:$0xff]  ;;  %v1738_v0 = vld [vmem:[%s4124_s7 + $0x5c] sm:$0xff] }
  0x8f   : > { %3927 = vmatprep.subr.msk.bf16.mxu0 %vm336_vm0, %v4401_v1  ;;  %v1444_v10 = vpack.c.bf16 %v1414_v46, %v1413_v36  ;;  %v1769_v2 = vpack.c.bf16 %v1738_v0, %v1737_v24  ;;  %v1770_v36 = vpack.c.bf16 %v1740_v3, %v1739_v26 }
  0x94   : > { %3733 = vmatmul.mubr.msk.bf16.gmra.mxu0 %vm281_vm1, %v1442_v4  ;;  %v1741_v4 = vld [vmem:[%s4124_s7 + $0x74] sm:$0xff] }
  0x95   : > { %3699 = vmatmul.mubr.msk.bf16.gmra.mxu1 %vm281_vm1, %v4272_v48  ;;  %3736 = vmatprep.mubr.msk.bf16.mxu0 %vm281_vm1, %v1443_v5  ;;  %v1417_v48 = vld [vmem:[%s4124_s7 + $0x83] sm:$0xff] }
  0x96   : > { %3702 = vmatprep.mubr.msk.bf16.mxu1 %vm281_vm1, %v4288_v58  ;;  %v1419_v58 = vld [vmem:[%s4124_s7 + $0x93] sm:$0xff]  ;;  %v1446_v15 = vpack.c.bf16 %v1418_v13, %v1417_v48  ;;  %v1742_v5 = vld [vmem:[%s4124_s7 + $0x7c] sm:$0xff] }
  0x97   : > { %v1447_v16 = vpack.c.bf16 %v1420_v14, %v1419_v58  ;;  %v1771_v1 = vpack.c.bf16 %v1742_v5, %v1741_v4  ;;  %v1745_v13 = vld [vmem:[%s4124_s7 + $0x94] sm:$0xff]  ;;  %v1746_v58 = vld [vmem:[%s4124_s7 + $0x9c] sm:$0xff]  ;;  %v1759_v4 = vld [vmem:[%s4124_s7 + $0x104] sm:$0xff] }
  0x98   : > { %v1760_v5 = vld [vmem:[%s4124_s7 + $0x10c] sm:$0xff] }
  0x9c   : > { %3737 = vmatmul.mubr.msk.bf16.gmra.mxu0 %vm281_vm1, %v1444_v10  ;;  %v1743_v10 = vld [vmem:[%s4124_s7 + $0x84] sm:$0xff] }
  0x9d   : > { %3703 = vmatmul.mubr.msk.bf16.gmra.mxu1 %vm281_vm1, %v4290_v60  ;;  %3740 = vmatprep.mubr.msk.bf16.mxu0 %vm281_vm1, %v1445_v12  ;;  %v1421_v60 = vld [vmem:[%s4124_s7 + $0xa3] sm:$0xff]  ;;  %v1744_v12 = vld [vmem:[%s4124_s7 + $0x8c] sm:$0xff] }
  0x9e   : > { %3706 = vmatprep.mubr.msk.bf16.mxu1 %vm281_vm1, %v4306_v6  ;;  %v1423_v6 = vld [vmem:[%s4124_s7 + $0xb3] sm:$0xff]  ;;  %v1448_v21 = vpack.c.bf16 %v1422_v17, %v1421_v60  ;;  %v1773_v17 = vpack.c.bf16 %v1746_v58, %v1745_v13 }
  0x9f   : > { %v1449_v23 = vpack.c.bf16 %v1424_v18, %v1423_v6 }
  0xa4   : > { %3741 = vmatmul.mubr.msk.bf16.gmra.mxu0 %vm281_vm1, %v1446_v15 }
  0xa5   : > { %3707 = vmatmul.mubr.msk.bf16.gmra.mxu1 %vm281_vm1, %v4308_v8  ;;  %3744 = vmatprep.mubr.msk.bf16.mxu0 %vm281_vm1, %v1447_v16  ;;  %v1425_v8 = vld [vmem:[%s4124_s7 + $0xc3] sm:$0xff]  ;;  %v1772_v16 = vpack.c.bf16 %v1744_v12, %v1743_v10 }
  0xa6   : > { %3710 = vmatprep.mubr.msk.bf16.mxu1 %vm281_vm1, %v4324_v19  ;;  %v1427_v19 = vld [vmem:[%s4124_s7 + $0xd3] sm:$0xff]  ;;  %v1450_v29 = vpack.c.bf16 %v1426_v27, %v1425_v8  ;;  %v1747_v8 = vld [vmem:[%s4124_s7 + $0xa4] sm:$0xff]  ;;  %v1762_v10 = vld [vmem:[%s4124_s7 + $0x11c] sm:$0xff] }
  0xa7   : > { %v1451_v25 = vpack.c.bf16 %v1428_v28, %v1427_v19  ;;  %v1748_v27 = vld [vmem:[%s4124_s7 + $0xac] sm:$0xff]  ;;  %v1749_v28 = vld [vmem:[%s4124_s7 + $0xb4] sm:$0xff] }
  0xac   : > { %3745 = vmatmul.mubr.msk.bf16.gmra.mxu0 %vm281_vm1, %v1448_v21 }
  0xad   : > { %3711 = vmatmul.mubr.msk.bf16.gmra.mxu1 %vm281_vm1, %v4326_v22  ;;  %3748 = vmatprep.mubr.msk.bf16.mxu0 %vm281_vm1, %v1449_v23  ;;  %v1429_v22 = vld [vmem:[%s4124_s7 + $0xe3] sm:$0xff] }
  0xae   : > { %3714 = vmatprep.mubr.msk.bf16.mxu1 %vm281_vm1, %v4342_v35  ;;  %v1452_v33 = vpack.c.bf16 %v1430_v30, %v1429_v22  ;;  %v1453_v35 = vpack.c.bf16 %v1432_v32, %v1431_v31  ;;  %v1774_v30 = vpack.c.bf16 %v1748_v27, %v1747_v8 }
  0xb4   : > { %3749 = vmatmul.mubr.msk.bf16.gmra.mxu0 %vm281_vm1, %v1450_v29  ;;  %v1750_v29 = vld [vmem:[%s4124_s7 + $0xbc] sm:$0xff] }
  0xb5   : > { %3715 = vmatmul.mubr.msk.bf16.gmra.mxu1 %vm281_vm1, %v4344_v38  ;;  %3752 = vmatprep.mubr.msk.bf16.mxu0 %vm281_vm1, %v1451_v25  ;;  %v1433_v38 = vld [vmem:[%s4124_s7 + $0x103] sm:$0xff]  ;;  %v1775_v32 = vpack.c.bf16 %v1750_v29, %v1749_v28 }
  0xb6   : > { %3718 = vmatprep.mubr.msk.bf16.mxu1 %vm281_vm1, %v4358_v47  ;;  %v1454_v45 = vpack.c.bf16 %v1434_v39, %v1433_v38  ;;  %v1130_v47 = vpack.c.bf16 %v1112_v40, %v1111_v37  ;;  %v1751_v39 = vld [vmem:[%s4124_s7 + $0xc4] sm:$0xff]  ;;  %v1752_v40 = vld [vmem:[%s4124_s7 + $0xcc] sm:$0xff] }
  0xbc   : > { %3753 = vmatmul.mubr.msk.bf16.gmra.mxu0 %vm281_vm1, %v1452_v33 }
  0xbd   : > { %3719 = vmatmul.mubr.msk.bf16.gmra.mxu1 %vm281_vm1, %v4360_v50  ;;  %3756 = vmatprep.mubr.msk.bf16.mxu0 %vm281_vm1, %v1453_v35  ;;  %v1765_v50 = vpack.c.bf16 %v1730_v44, %v1729_v43  ;;  %v1754_v43 = vld [vmem:[%s4124_s7 + $0xdc] sm:$0xff] }
  0xbe   : > { %3722 = vmatprep.mubr.msk.bf16.mxu1 %vm281_vm1, %v4373_v55  ;;  %v1733_v55 = vld [vmem:[%s4124_s7 + $0x34] sm:$0xff] }
  0xbf   : > { %v1767_v61 = vpack.c.bf16 %v1734_v56, %v1733_v55  ;;  %v1755_v55 = vld [vmem:[%s4124_s7 + $0xe4] sm:$0xff]  ;;  %v1756_v56 = vld [vmem:[%s4124_s7 + $0xec] sm:$0xff] }
  0xc0   : > { %v1778_v63 = vpack.c.bf16 %v1756_v56, %v1755_v55 }
  0xc4   : > { %3757 = vmatmul.mubr.msk.bf16.gmra.mxu0 %vm281_vm1, %v1454_v45 }
  0xc5   : > { %3723 = vmatmul.mubr.msk.bf16.gmra.mxu1 %vm281_vm1, %v1130_v47  ;;  %3760 = vmatprep.mubr.msk.bf16.mxu0 %vm281_vm1, %v1455_v49  ;;  %v1776_v47 = vpack.c.bf16 %v1752_v40, %v1751_v39  ;;  %v1763_v39 = vld [vmem:[%s4124_s7 + $0x124] sm:$0xff]  ;;  %v1764_v40 = vld [vmem:[%s4124_s7 + $0x12c] sm:$0xff] }
  0xc6   : > { %3766 = vmatprep.mubr.msk.bf16.mxu1 %vm281_vm1, %v1765_v50  ;;  %v1777_v50 = vpack.c.bf16 %v1754_v43, %v1753_v42 }
  0xcc   : > { %3761 = vmatmul.mubr.msk.bf16.gmra.mxu0 %vm281_vm1, %v1456_v57 }
  0xcd   : > { %3767 = vmatmul.mubr.msk.bf16.vlgmr.msra.gmra.mxu1 %vm281_vm1, %v1766_v20  ;;  %3804 = vmatprep.mubr.msk.bf16.mxu0 %vm281_vm1, %v1766_v20  ;;  %v1757_v20 = vld [vmem:[%s4124_s7 + $0xf4] sm:$0xff] }
  0xce   : > { %3841 = vmatpush3.bf16.msra.mxu1 %v2492_v11  ;;  %3770 = vmatprep.mubr.msk.bf16.mxu1 %vm281_vm1, %v1767_v61 }
  0xd4   : > { %3805 = vmatmul.mubr.msk.bf16.vlgmr.msra.gmra.mxu0 %vm281_vm1, %v1767_v61  ;;  %v1758_v61 = vld [vmem:[%s4124_s7 + $0xfc] sm:$0xff] }
  0xd5   : > { %3771 = vmatmul.mubr.msk.bf16.gmra.mxu1 %vm281_vm1, %v1768_v34  ;;  %3879 = vmatpush3.bf16.msra.mxu0 %v2818_v59  ;;  %v1779_v0 = vpack.c.bf16 %v1758_v61, %v1757_v20 }
  0xd6   : > { %3774 = vmatprep.mubr.msk.bf16.mxu1 %vm281_vm1, %v1769_v2  ;;  %3808 = vmatprep.mubr.msk.bf16.mxu0 %vm281_vm1, %v1768_v34 }
  0xdc   : > { %v4508_v46 = vpop.f32.mrf.mxu0  ;;  %3809 = vmatmul.mubr.msk.bf16.gmra.mxu0 %vm281_vm1, %v1769_v2 }
  0xdd   : > { %v4511_v7 = vpop.f32.mrf.mxu1  ;;  %3775 = vmatmul.mubr.msk.bf16.gmra.mxu1 %vm281_vm1, %v1770_v36  ;;  %3812 = vmatprep.mubr.msk.bf16.mxu0 %vm281_vm1, %v1770_v36 }
  0xde   : > { %v4515_v9 = vpop.f32.mrf.mxu0  ;;  %3778 = vmatprep.mubr.msk.bf16.mxu1 %vm281_vm1, %v1771_v1 }
  0xdf   : > { %v4520_v48 = vpop.f32.mrf.mxu1 }
  0xe0   : > { %v4524_v14 = vpop.f32.mrf.mxu0 }
  0xe1   : > { %v4526_v15 = vpop.f32.mrf.mxu1 }
  0xe2   : > { %v4528_v60 = vpop.f32.mrf.mxu0 }
  0xe3   : > { %v4530_v6 = vpop.f32.mrf.mxu1 }
  0xe4   : > { %v4532_v18 = vpop.f32.mrf.mxu0  ;;  %3813 = vmatmul.mubr.msk.bf16.gmra.mxu0 %vm281_vm1, %v1771_v1  ;;  %v1761_v1 = vld [vmem:[%s4124_s7 + $0x114] sm:$0xff] }
  0xe5   : > { %v4535_v21 = vpop.f32.mrf.mxu1  ;;  %3779 = vmatmul.mubr.msk.bf16.gmra.mxu1 %vm281_vm1, %v1772_v16  ;;  %3816 = vmatprep.mubr.msk.bf16.mxu0 %vm281_vm1, %v1772_v16  ;;  %v1780_v16 = vpack.c.bf16 %v1760_v5, %v1759_v4  ;;  %v1781_v8 = vpack.c.bf16 %v1762_v10, %v1761_v1  ;;  %v2090_v1 = vld [vmem:[%s4124_s7 + $0x13c] sm:$0xff] }
  0xe6   : > { %v4539_v23 = vpop.f32.mrf.mxu0  ;;  %3782 = vmatprep.mubr.msk.bf16.mxu1 %vm281_vm1, %v1773_v17  ;;  %v2383_v10 = vld [vmem:[%s4124_s7 + $0x35] sm:$0xff] }
  0xe7   : > { %v4544_v19 = vpop.f32.mrf.mxu1 }
  0xe8   : > { %v4548_v25 = vpop.f32.mrf.mxu0 }
  0xe9   : > { %v4550_v22 = vpop.f32.mrf.mxu1 }
  0xea   : > { %v4552_v31 = vpop.f32.mrf.mxu0 }
  0xeb   : > { %v4554_v33 = vpop.f32.mrf.mxu1 }
  0xec   : > { %v4556_v35 = vpop.f32.mrf.mxu0  ;;  %3817 = vmatmul.mubr.msk.bf16.gmra.mxu0 %vm281_vm1, %v1773_v17 }
  0xed   : > { %v4559_v37 = vpop.f32.mrf.mxu1  ;;  %3783 = vmatmul.mubr.msk.bf16.gmra.mxu1 %vm281_vm1, %v1774_v30  ;;  %3820 = vmatprep.mubr.msk.bf16.mxu0 %vm281_vm1, %v1774_v30 }
  0xee   : > { %v4563_v38 = vpop.f32.mrf.mxu0  ;;  %3786 = vmatprep.mubr.msk.bf16.mxu1 %vm281_vm1, %v1775_v32 }
  0xef   : > { %v4568_v41 = vpop.f32.mrf.mxu1 }
  0xf0   : > { %v4572_v44 = vpop.f32.mrf.mxu0 }
  0xf1   : > { %v4574_v45 = vpop.f32.mrf.mxu1 }
  0xf2   : > { %v4576_v49 = vpop.f32.mrf.mxu0 }
  0xf3   : > { %v4578_v51 = vpop.f32.mrf.mxu1 }
  0xf4   : > { %v4580_v52 = vpop.f32.mrf.mxu0  ;;  %3821 = vmatmul.mubr.msk.bf16.gmra.mxu0 %vm281_vm1, %v1775_v32 }
  0xf5   : > { %v4583_v53 = vpop.f32.mrf.mxu1  ;;  %3787 = vmatmul.mubr.msk.bf16.gmra.mxu1 %vm281_vm1, %v1776_v47  ;;  %3824 = vmatprep.mubr.msk.bf16.mxu0 %vm281_vm1, %v1776_v47  ;;  %v2382_v47 = vld [vmem:[%s4124_s7 + $0x2d] sm:$0xff] }
  0xf6   : > { %v4587_v54 = vpop.f32.mrf.mxu0  ;;  %3790 = vmatprep.mubr.msk.bf16.mxu1 %vm281_vm1, %v1777_v50 }
  0xf7   : > { %v4592_v57 = vpop.f32.mrf.mxu1 }
  0xf8   : > { %v4596_v11 = vpop.f32.mrf.mxu0 }
  0xf9   : > { %v4598_v62 = vpop.f32.mrf.mxu1 }
  0xfa   : > { %v4600_v24 = vpop.f32.mrf.mxu0 }
  0xfb   : > { %v4602_v34 = vpop.f32.mrf.mxu1 }
  0xfc   : > { %v4604_v59 = vpop.f32.mrf.mxu0  ;;  %3825 = vmatmul.mubr.msk.bf16.gmra.mxu0 %vm281_vm1, %v1777_v50 }
  0xfd   : > { %v3616_v2 = vpop.f32.mrf.mxu1  ;;  %3791 = vmatmul.mubr.msk.bf16.gmra.mxu1 %vm281_vm1, %v1778_v63  ;;  %3828 = vmatprep.mubr.msk.bf16.mxu0 %vm281_vm1, %v1778_v63 }
  0xfe   : > { %v617_v26 = vadd.f32 %v3616_v2, %v4508_v46  ;;  %v4610_v3 = vpop.f32.mrf.mxu0  ;;  %3794 = vmatprep.mubr.msk.bf16.mxu1 %vm281_vm1, %v1779_v0 }
  0xff   : > { %v608_v36 = vpop.f32.mrf.mxu1 }
 0x100   : > { %v609_v12 = vadd.f32 %v608_v36, %v4515_v9  ;;  %v4618_v13 = vpop.f32.mrf.mxu0 }
 0x101   : > { %v3617_v58 = vpop.f32.mrf.mxu1 }
 0x102   : > { %v620_v17 = vadd.f32 %v3617_v58, %v4524_v14  ;;  %v4621_v46 = vpop.f32.mrf.mxu0 }
 0x103   : > { %v611_v27 = vpop.f32.mrf.mxu1 }
 0x104   : > { %v612_v28 = vadd.f32 %v611_v27, %v4528_v60  ;;  %v3654_v29 = vpop.f32.mrf.mxu0  ;;  %3829 = vmatmul.mubr.msk.bf16.gmra.mxu0 %vm281_vm1, %v1779_v0  ;;  %v2381_v60 = vld [vmem:[%s4124_s7 + $0x25] sm:$0xff] }
 0x105   : > { %v3620_v9 = vpop.f32.mrf.mxu1  ;;  %v4625_v30 = vadd.f32 %v3654_v29, %v617_v26  ;;  %3795 = vmatmul.mubr.msk.bf16.gmra.mxu1 %vm281_vm1, %v1780_v16  ;;  %3832 = vmatprep.mubr.msk.bf16.mxu0 %vm281_vm1, %v1780_v16  ;;  %v2417_v0 = vpack.c.bf16 %v2382_v47, %v2381_v60  ;;  %v2707_v16 = vld [vmem:[%s4124_s7 + $0x26] sm:$0xff] }
 0x106   : > { %v633_v14 = vadd.f32 %v3620_v9, %v4532_v18  ;;  %v898_v32 = vpop.f32.mrf.mxu0  ;;  %3798 = vmatprep.mubr.msk.bf16.mxu1 %vm281_vm1, %v1781_v8  ;;  %v1782_v18 = vpack.c.bf16 %v1764_v40, %v1763_v39  ;;  %v2386_v29 = vld [vmem:[%s4124_s7 + $0x4d] sm:$0xff] }
 0x107   : > { %v624_v42 = vpop.f32.mrf.mxu1  ;;  %v4633_v43 = vadd.f32 %v898_v32, %v609_v12 }
 0x108   : > { %v625_v50 = vadd.f32 %v624_v42, %v4539_v23  ;;  %v3655_v55 = vpop.f32.mrf.mxu0 }
 0x109   : > { %v3621_v56 = vpop.f32.mrf.mxu1  ;;  %v4638_v20 = vadd.f32 %v3655_v55, %v620_v17  ;;  %v2708_v17 = vld [vmem:[%s4124_s7 + $0x2e] sm:$0xff] }
 0x10a   : > { %v636_v61 = vadd.f32 %v3621_v56, %v4548_v25  ;;  %v901_v63 = vpop.f32.mrf.mxu0  ;;  %v2089_v25 = vld [vmem:[%s4124_s7 + $0x134] sm:$0xff]  ;;  %v2743_v42 = vpack.c.bf16 %v2708_v17, %v2707_v16 }
 0x10b   : > { %v627_v2 = vpop.f32.mrf.mxu1  ;;  %v4641_v26 = vadd.f32 %v901_v63, %v612_v28  ;;  %v2385_v28 = vld [vmem:[%s4124_s7 + $0x45] sm:$0xff]  ;;  %v2108_v32 = vpack.c.bf16 %v2090_v1, %v2089_v25  ;;  %v2712_v25 = vld [vmem:[%s4124_s7 + $0x4e] sm:$0xff] }
 0x10c   : > { %v628_v23 = vadd.f32 %v627_v2, %v4552_v31  ;;  %v3658_v4 = vpop.f32.mrf.mxu0  ;;  %3833 = vmatmul.mubr.msk.bf16.gmra.mxu0 %vm281_vm1, %v1781_v8  ;;  %v2384_v31 = vld [vmem:[%s4124_s7 + $0x3d] sm:$0xff]  ;;  %v2419_v55 = vpack.c.bf16 %v2386_v29, %v2385_v28 }
 0x10d   : > { %v3624_v5 = vpop.f32.mrf.mxu1  ;;  %v4645_v36 = vadd.f32 %v3658_v4, %v633_v14  ;;  %3799 = vmatmul.mubr.msk.bf16.gmra.mxu1 %vm281_vm1, %v1782_v18  ;;  %3836 = vmatprep.mubr.msk.bf16.mxu0 %vm281_vm1, %v1782_v18  ;;  %v2710_v2 = vld [vmem:[%s4124_s7 + $0x3e] sm:$0xff] }
 0x10e   : > { %v649_v12 = vadd.f32 %v3624_v5, %v4556_v35  ;;  %v914_v58 = vpop.f32.mrf.mxu0  ;;  %3842 = vmatprep.mubr.msk.bf16.mxu1 %vm281_vm1, %v2417_v0  ;;  %v2418_v35 = vpack.c.bf16 %v2384_v31, %v2383_v10  ;;  %v2709_v0 = vld [vmem:[%s4124_s7 + $0x36] sm:$0xff]  ;;  %v2711_v5 = vld [vmem:[%s4124_s7 + $0x46] sm:$0xff] }
 0x10f   : > { %v640_v8 = vpop.f32.mrf.mxu1  ;;  %v4657_v27 = vadd.f32 %v914_v58, %v625_v50  ;;  %v2390_v58 = vld [vmem:[%s4124_s7 + $0x6d] sm:$0xff]  ;;  %v2744_v17 = vpack.c.bf16 %v2710_v2, %v2709_v0  ;;  %v2745_v29 = vpack.c.bf16 %v2712_v25, %v2711_v5 }
 0x110   : > { %v641_v9 = vadd.f32 %v640_v8, %v4563_v38  ;;  %v3659_v14 = vpop.f32.mrf.mxu0 }
 0x111   : > { %v3625_v39 = vpop.f32.mrf.mxu1  ;;  %v4662_v40 = vadd.f32 %v3659_v14, %v636_v61 }
 0x112   : > { %v652_v60 = vadd.f32 %v3625_v39, %v4572_v44  ;;  %v917_v47 = vpop.f32.mrf.mxu0  ;;  %v2387_v44 = vld [vmem:[%s4124_s7 + $0x55] sm:$0xff] }
 0x113   : > { %v643_v50 = vpop.f32.mrf.mxu1  ;;  %v4665_v56 = vadd.f32 %v917_v47, %v628_v23 }
 0x114   : > { %v644_v38 = vadd.f32 %v643_v50, %v4576_v49  ;;  %v3662_v18 = vpop.f32.mrf.mxu0  ;;  %3837 = vmatmul.mubr.msk.bf16.gmra.mxu0 %vm281_vm1, %v2108_v32  ;;  %v2388_v49 = vld [vmem:[%s4124_s7 + $0x5d] sm:$0xff] }
 0x115   : > { %v3628_v61 = vpop.f32.mrf.mxu1  ;;  %v4669_v63 = vadd.f32 %v3662_v18, %v649_v12  ;;  %3843 = vmatmul.mubr.msk.bf16.vlgmr.msra.gmra.mxu1 %vm281_vm1, %v2418_v35  ;;  %3880 = vmatprep.mubr.msk.bf16.mxu0 %vm281_vm1, %v2743_v42  ;;  %v2389_v12 = vld [vmem:[%s4124_s7 + $0x65] sm:$0xff] }
 0x116   : > { %v665_v23 = vadd.f32 %v3628_v61, %v4580_v52  ;;  %v930_v4 = vpop.f32.mrf.mxu0  ;;  %3846 = vmatprep.mubr.msk.bf16.mxu1 %vm281_vm1, %v2419_v55  ;;  %v2420_v52 = vpack.c.bf16 %v2388_v49, %v2387_v44  ;;  %v2421_v39 = vpack.c.bf16 %v2390_v58, %v2389_v12  ;;  %v2713_v55 = vld [vmem:[%s4124_s7 + $0x56] sm:$0xff]  ;;  %v2714_v50 = vld [vmem:[%s4124_s7 + $0x5e] sm:$0xff]  ;;  %v2715_v61 = vld [vmem:[%s4124_s7 + $0x66] sm:$0xff] }
 0x117   : > { %v656_v1 = vpop.f32.mrf.mxu1  ;;  %v4681_v10 = vadd.f32 %v930_v4, %v641_v9  ;;  %v2716_v44 = vld [vmem:[%s4124_s7 + $0x6e] sm:$0xff]  ;;  %v2746_v25 = vpack.c.bf16 %v2714_v50, %v2713_v55  ;;  %v2397_v50 = vld [vmem:[%s4124_s7 + $0xa5] sm:$0xff] }
 0x118   : > { %v657_v31 = vadd.f32 %v656_v1, %v4587_v54  ;;  %v3663_v16 = vpop.f32.mrf.mxu0  ;;  %v2394_v4 = vld [vmem:[%s4124_s7 + $0x8d] sm:$0xff]  ;;  %v2747_v58 = vpack.c.bf16 %v2716_v44, %v2715_v61 }
 0x119   : > { %v3629_v8 = vpop.f32.mrf.mxu1  ;;  %v4686_v28 = vadd.f32 %v3663_v16, %v652_v60 }
 0x11a   : > { %v668_v14 = vadd.f32 %v3629_v8, %v4596_v11  ;;  %v933_v32 = vpop.f32.mrf.mxu0  ;;  %v2391_v11 = vld [vmem:[%s4124_s7 + $0x75] sm:$0xff] }
 0x11b   : > { %v659_v9 = vpop.f32.mrf.mxu1  ;;  %v4689_v35 = vadd.f32 %v933_v32, %v644_v38 }
 0x11c   : > { %v660_v54 = vadd.f32 %v659_v9, %v4600_v24  ;;  %v3666_v42 = vpop.f32.mrf.mxu0  ;;  %3881 = vmatmul.mubr.msk.bf16.vlgmr.msra.gmra.mxu0 %vm281_vm1, %v2744_v17  ;;  %v2392_v24 = vld [vmem:[%s4124_s7 + $0x7d] sm:$0xff] }
 0x11d   : > { %v3632_v60 = vpop.f32.mrf.mxu1  ;;  %v4693_v47 = vadd.f32 %v3666_v42, %v665_v23  ;;  %3847 = vmatmul.mubr.msk.bf16.gmra.mxu1 %vm281_vm1, %v2420_v52  ;;  %3884 = vmatprep.mubr.msk.bf16.mxu0 %vm281_vm1, %v2745_v29  ;;  %v2393_v23 = vld [vmem:[%s4124_s7 + $0x85] sm:$0xff] }
 0x11e   : > { %v681_v38 = vadd.f32 %v3632_v60, %v4604_v59  ;;  %v946_v18 = vpop.f32.mrf.mxu0  ;;  %3850 = vmatprep.mubr.msk.bf16.mxu1 %vm281_vm1, %v2421_v39  ;;  %v2422_v59 = vpack.c.bf16 %v2392_v24, %v2391_v11  ;;  %v2717_v39 = vld [vmem:[%s4124_s7 + $0x76] sm:$0xff]  ;;  %v2718_v9 = vld [vmem:[%s4124_s7 + $0x7e] sm:$0xff]  ;;  %v2720_v60 = vld [vmem:[%s4124_s7 + $0x8e] sm:$0xff] }
 0x11f   : > { %v672_v0 = vpop.f32.mrf.mxu1  ;;  %v4705_v2 = vadd.f32 %v946_v18, %v657_v31  ;;  %v2423_v31 = vpack.c.bf16 %v2394_v4, %v2393_v23  ;;  %v2398_v18 = vld [vmem:[%s4124_s7 + $0xad] sm:$0xff]  ;;  %v2748_v24 = vpack.c.bf16 %v2718_v9, %v2717_v39 }
 0x120   : > { %v673_v49 = vadd.f32 %v672_v0, %v4610_v3  ;;  %v3667_v5 = vpop.f32.mrf.mxu0 }
 0x121   : > { %v3633_v1 = vpop.f32.mrf.mxu1  ;;  %v4710_v12 = vadd.f32 %v3667_v5, %v668_v14  ;;  %v2425_v5 = vpack.c.bf16 %v2398_v18, %v2397_v50 }
 0x122   : > { %v684_v16 = vadd.f32 %v3633_v1, %v4618_v13  ;;  %v949_v17 = vpop.f32.mrf.mxu0  ;;  %v2395_v13 = vld [vmem:[%s4124_s7 + $0x95] sm:$0xff] }
 0x123   : > { %v675_v8 = vpop.f32.mrf.mxu1  ;;  %v4713_v52 = vadd.f32 %v949_v17, %v660_v54  ;;  %v2396_v54 = vld [vmem:[%s4124_s7 + $0x9d] sm:$0xff] }
 0x124   : > { %v676_v3 = vadd.f32 %v675_v8, %v4621_v46  ;;  %v3670_v29 = vpop.f32.mrf.mxu0  ;;  %3885 = vmatmul.mubr.msk.bf16.gmra.mxu0 %vm281_vm1, %v2746_v25  ;;  %v2719_v46 = vld [vmem:[%s4124_s7 + $0x86] sm:$0xff]  ;;  %v2424_v0 = vpack.c.bf16 %v2396_v54, %v2395_v13  ;;  %v2722_v8 = vld [vmem:[%s4124_s7 + $0x9e] sm:$0xff]  ;;  %v2724_v13 = vld [vmem:[%s4124_s7 + $0xae] sm:$0xff] }
 0x125   : > { %v3636_v14 = vpop.f32.mrf.mxu1  ;;  %v4717_v32 = vadd.f32 %v3670_v29, %v681_v38  ;;  %3851 = vmatmul.mubr.msk.bf16.gmra.mxu1 %vm281_vm1, %v2422_v59  ;;  %3888 = vmatprep.mubr.msk.bf16.mxu0 %vm281_vm1, %v2747_v58  ;;  %v2749_v23 = vpack.c.bf16 %v2720_v60, %v2719_v46  ;;  %v2402_v54 = vld [vmem:[%s4124_s7 + $0xcd] sm:$0xff] }
 0x126   : > { %v962_v42 = vpop.f32.mrf.mxu0  ;;  %3854 = vmatprep.mubr.msk.bf16.mxu1 %vm281_vm1, %v2423_v31  ;;  %v697_v25 = vadd.f32 %v3636_v14, %v4511_v7  ;;  %v2399_v7 = vld [vmem:[%s4124_s7 + $0xb5] sm:$0xff]  ;;  %v2723_v14 = vld [vmem:[%s4124_s7 + $0xa6] sm:$0xff] }
 0x127   : > { %v688_v11 = vpop.f32.mrf.mxu1  ;;  %v4728_v55 = vadd.f32 %v962_v42, %v673_v49  ;;  %v2721_v31 = vld [vmem:[%s4124_s7 + $0x96] sm:$0xff]  ;;  %v2401_v42 = vld [vmem:[%s4124_s7 + $0xc5] sm:$0xff] }
 0x128   : > { %v3671_v38 = vpop.f32.mrf.mxu0  ;;  %v689_v58 = vadd.f32 %v688_v11, %v4520_v48  ;;  %v2750_v60 = vpack.c.bf16 %v2722_v8, %v2721_v31  ;;  %v2727_v31 = vld [vmem:[%s4124_s7 + $0xc6] sm:$0xff]  ;;  %v2728_v8 = vld [vmem:[%s4124_s7 + $0xce] sm:$0xff] }
 0x129   : > { %v3637_v61 = vpop.f32.mrf.mxu1  ;;  %v4732_v44 = vadd.f32 %v3671_v38, %v684_v16 }
 0x12a   : > { %v965_v4 = vpop.f32.mrf.mxu0  ;;  %v700_v48 = vadd.f32 %v3637_v61, %v4526_v15 }
 0x12b   : > { %v691_v49 = vpop.f32.mrf.mxu1  ;;  %v4735_v1 = vadd.f32 %v965_v4, %v676_v3  ;;  %v2400_v3 = vld [vmem:[%s4124_s7 + $0xbd] sm:$0xff] }
 0x12c   : > { %v3674_v59 = vpop.f32.mrf.mxu0  ;;  %3889 = vmatmul.mubr.msk.bf16.gmra.mxu0 %vm281_vm1, %v2748_v24  ;;  %v692_v11 = vadd.f32 %v691_v49, %v4530_v6  ;;  %v2426_v38 = vpack.c.bf16 %v2400_v3, %v2399_v7  ;;  %v2751_v24 = vpack.c.bf16 %v2724_v13, %v2723_v14  ;;  %v2404_v7 = vld [vmem:[%s4124_s7 + $0xdd] sm:$0xff]  ;;  %v2405_v14 = vld [vmem:[%s4124_s7 + $0xe5] sm:$0xff]  ;;  %v2406_v13 = vld [vmem:[%s4124_s7 + $0xed] sm:$0xff] }
 0x12d   : > { %v3640_v16 = vpop.f32.mrf.mxu1  ;;  %v4739_v17 = vadd.f32 %v3674_v59, %v697_v25  ;;  %3855 = vmatmul.mubr.msk.bf16.gmra.mxu1 %vm281_vm1, %v2424_v0  ;;  %3892 = vmatprep.mubr.msk.bf16.mxu0 %vm281_vm1, %v2749_v23  ;;  %v2427_v23 = vpack.c.bf16 %v2402_v54, %v2401_v42  ;;  %v2725_v59 = vld [vmem:[%s4124_s7 + $0xb6] sm:$0xff] }
 0x12e   : > { %v978_v29 = vpop.f32.mrf.mxu0  ;;  %3858 = vmatprep.mubr.msk.bf16.mxu1 %vm281_vm1, %v2425_v5  ;;  %v713_v15 = vadd.f32 %v3640_v16, %v4535_v21  ;;  %v2403_v21 = vld [vmem:[%s4124_s7 + $0xd5] sm:$0xff] }
 0x12f   : > { %v704_v39 = vpop.f32.mrf.mxu1  ;;  %v4751_v9 = vadd.f32 %v978_v29, %v689_v58  ;;  %v2726_v58 = vld [vmem:[%s4124_s7 + $0xbe] sm:$0xff] }
 0x130   : > { %v3675_v46 = vpop.f32.mrf.mxu0  ;;  %v705_v6 = vadd.f32 %v704_v39, %v4544_v19  ;;  %v2752_v39 = vpack.c.bf16 %v2726_v58, %v2725_v59  ;;  %v2731_v59 = vld [vmem:[%s4124_s7 + $0xe6] sm:$0xff]  ;;  %v2732_v58 = vld [vmem:[%s4124_s7 + $0xee] sm:$0xff] }
 0x131   : > { %v3641_v50 = vpop.f32.mrf.mxu1  ;;  %v4756_v18 = vadd.f32 %v3675_v46, %v700_v48 }
 0x132   : > { %v981_v0 = vpop.f32.mrf.mxu0  ;;  %v716_v19 = vadd.f32 %v3641_v50, %v4550_v22 }
 0x133   : > { %v707_v61 = vpop.f32.mrf.mxu1  ;;  %v4759_v4 = vadd.f32 %v981_v0, %v692_v11  ;;  %v2753_v11 = vpack.c.bf16 %v2728_v8, %v2727_v31  ;;  %v2409_v31 = vld [vmem:[%s4124_s7 + $0x105] sm:$0xff]  ;;  %v2410_v8 = vld [vmem:[%s4124_s7 + $0x10d] sm:$0xff] }
 0x134   : > { %v3678_v5 = vpop.f32.mrf.mxu0  ;;  %3893 = vmatmul.mubr.msk.bf16.gmra.mxu0 %vm281_vm1, %v2750_v60  ;;  %v708_v42 = vadd.f32 %v707_v61, %v4554_v33  ;;  %v2428_v60 = vpack.c.bf16 %v2404_v7, %v2403_v21  ;;  %v2408_v21 = vld [vmem:[%s4124_s7 + $0xfd] sm:$0xff] }
 0x135   : > { %v3644_v25 = vpop.f32.mrf.mxu1  ;;  %v4763_v49 = vadd.f32 %v3678_v5, %v713_v15  ;;  %3859 = vmatmul.mubr.msk.bf16.gmra.mxu1 %vm281_vm1, %v2426_v38  ;;  %3896 = vmatprep.mubr.msk.bf16.mxu0 %vm281_vm1, %v2751_v24  ;;  %v2429_v24 = vpack.c.bf16 %v2406_v13, %v2405_v14  ;;  %v2729_v5 = vld [vmem:[%s4124_s7 + $0xd6] sm:$0xff] }
 0x136   : > { %v994_v16 = vpop.f32.mrf.mxu0  ;;  %3862 = vmatprep.mubr.msk.bf16.mxu1 %vm281_vm1, %v2427_v23  ;;  %v729_v22 = vadd.f32 %v3644_v25, %v4559_v37  ;;  %v2407_v37 = vld [vmem:[%s4124_s7 + $0xf5] sm:$0xff] }
 0x137   : > { %v720_v29 = vpop.f32.mrf.mxu1  ;;  %v4775_v3 = vadd.f32 %v994_v16, %v705_v6  ;;  %v2730_v6 = vld [vmem:[%s4124_s7 + $0xde] sm:$0xff] }
 0x138   : > { %v3679_v48 = vpop.f32.mrf.mxu0  ;;  %v721_v33 = vadd.f32 %v720_v29, %v4568_v41  ;;  %v2754_v29 = vpack.c.bf16 %v2730_v6, %v2729_v5  ;;  %v2412_v5 = vld [vmem:[%s4124_s7 + $0x11d] sm:$0xff]  ;;  %v2735_v6 = vld [vmem:[%s4124_s7 + $0x106] sm:$0xff] }
 0x139   : > { %v3645_v54 = vpop.f32.mrf.mxu1  ;;  %v4780_v46 = vadd.f32 %v3679_v48, %v716_v19 }
 0x13a   : > { %v997_v38 = vpop.f32.mrf.mxu0  ;;  %v732_v41 = vadd.f32 %v3645_v54, %v4574_v45 }
 0x13b   : > { %v723_v50 = vpop.f32.mrf.mxu1  ;;  %v4783_v0 = vadd.f32 %v997_v38, %v708_v42  ;;  %v2755_v42 = vpack.c.bf16 %v2732_v58, %v2731_v59  ;;  %v2413_v58 = vld [vmem:[%s4124_s7 + $0x125] sm:$0xff] }
 0x13c   : > { %v3682_v23 = vpop.f32.mrf.mxu0  ;;  %3897 = vmatmul.mubr.msk.bf16.gmra.mxu0 %vm281_vm1, %v2752_v39  ;;  %v724_v14 = vadd.f32 %v723_v50, %v4578_v51  ;;  %v2430_v39 = vpack.c.bf16 %v2408_v21, %v2407_v37 }
 0x13d   : > { %v3648_v15 = vpop.f32.mrf.mxu1  ;;  %v4787_v61 = vadd.f32 %v3682_v23, %v729_v22  ;;  %3863 = vmatmul.mubr.msk.bf16.gmra.mxu1 %vm281_vm1, %v2428_v60  ;;  %3900 = vmatprep.mubr.msk.bf16.mxu0 %vm281_vm1, %v2753_v11  ;;  %v2431_v11 = vpack.c.bf16 %v2410_v8, %v2409_v31  ;;  %v2733_v23 = vld [vmem:[%s4124_s7 + $0xf6] sm:$0xff] }
 0x13e   : > { %v1010_v25 = vpop.f32.mrf.mxu0  ;;  %3866 = vmatprep.mubr.msk.bf16.mxu1 %vm281_vm1, %v2429_v24  ;;  %v745_v45 = vadd.f32 %v3648_v15, %v4583_v53  ;;  %v2411_v53 = vld [vmem:[%s4124_s7 + $0x115] sm:$0xff] }
 0x13f   : > { %v736_v16 = vpop.f32.mrf.mxu1  ;;  %v4799_v7 = vadd.f32 %v1010_v25, %v721_v33  ;;  %v2734_v33 = vld [vmem:[%s4124_s7 + $0xfe] sm:$0xff] }
 0x140   : > { %v3683_v19 = vpop.f32.mrf.mxu0  ;;  %v737_v51 = vadd.f32 %v736_v16, %v4592_v57  ;;  %v2736_v57 = vld [vmem:[%s4124_s7 + $0x10e] sm:$0xff]  ;;  %v2756_v8 = vpack.c.bf16 %v2734_v33, %v2733_v23  ;;  %v2416_v23 = vld [vmem:[%s4124_s7 + $0x13d] sm:$0xff] }
 0x141   : > { %v3649_v13 = vpop.f32.mrf.mxu1  ;;  %v4804_v48 = vadd.f32 %v3683_v19, %v732_v41  ;;  %v2414_v41 = vld [vmem:[%s4124_s7 + $0x12d] sm:$0xff] }
 0x142   : > { %v1013_v60 = vpop.f32.mrf.mxu0  ;;  %v748_v25 = vadd.f32 %v3649_v13, %v4598_v62  ;;  %v2740_v33 = vld [vmem:[%s4124_s7 + $0x12e] sm:$0xff] }
 0x143   : > { %v739_v54 = vpop.f32.mrf.mxu1  ;;  %v4807_v38 = vadd.f32 %v1013_v60, %v724_v14  ;;  %v2432_v14 = vpack.c.bf16 %v2412_v5, %v2411_v53 }
 0x144   : > { %v3686_v24 = vpop.f32.mrf.mxu0  ;;  %3901 = vmatmul.mubr.msk.bf16.gmra.mxu0 %vm281_vm1, %v2754_v29  ;;  %v740_v19 = vadd.f32 %v739_v54, %v4602_v34 }
 0x145   : > { %v4811_v22 = vadd.f32 %v3686_v24, %v745_v45  ;;  %v3692_v50 = vpop.f32.mrf.mxu1  ;;  %3867 = vmatmul.mubr.msk.bf16.gmra.mxu1 %vm281_vm1, %v2430_v39  ;;  %3904 = vmatprep.mubr.msk.bf16.mxu0 %vm281_vm1, %v2755_v42  ;;  %v2757_v39 = vpack.c.bf16 %v2736_v57, %v2735_v6  ;;  %v2433_v42 = vpack.c.bf16 %v2414_v41, %v2413_v58  ;;  %v2737_v24 = vld [vmem:[%s4124_s7 + $0x116] sm:$0xff] }
 0x146   : > { %v1369_v15 = vadd.f32 %v3692_v50, %v4625_v30  ;;  %v1026_v37 = vpop.f32.mrf.mxu0  ;;  %3870 = vmatprep.mubr.msk.bf16.mxu1 %vm281_vm1, %v2431_v11 }
 0x147   : > { %v4824_v21 = vadd.f32 %v1026_v37, %v737_v51  ;;  %v1224_v59 = vpop.f32.mrf.mxu1  ;;  %v2738_v51 = vld [vmem:[%s4124_s7 + $0x11e] sm:$0xff] }
 0x148   : > { %v1367_v16 = vadd.f32 %v1224_v59, %v4633_v43  ;;  %v3687_v31 = vpop.f32.mrf.mxu0  ;;  %v2758_v57 = vpack.c.bf16 %v2738_v51, %v2737_v24 }
 0x149   : > { %v4830_v30 = vadd.f32 %v3687_v31, %v748_v25  ;;  %v3693_v29 = vpop.f32.mrf.mxu1 }
 0x14a   : > { %v1370_v62 = vadd.f32 %v3693_v29, %v4638_v20  ;;  %v1029_v13 = vpop.f32.mrf.mxu0  ;;  %v2415_v20 = vld [vmem:[%s4124_s7 + $0x135] sm:$0xff] }
 0x14b   : > { %v4833_v60 = vadd.f32 %v1029_v13, %v740_v19  ;;  %v1227_v43 = vpop.f32.mrf.mxu1  ;;  %v2434_v58 = vpack.c.bf16 %v2416_v23, %v2415_v20 }
 0x14c   : > { %v1368_v34 = vadd.f32 %v1227_v43, %v4641_v26  ;;  %v3730_v11 = vpop.f32.mrf.mxu0  ;;  %3905 = vmatmul.mubr.msk.bf16.gmra.mxu0 %vm281_vm1, %v2756_v8  ;;  %v2739_v26 = vld [vmem:[%s4124_s7 + $0x126] sm:$0xff] }
 0x14d   : > { %v3696_v45 = vpop.f32.mrf.mxu1  ;;  %v4837_v54 = vadd.f32 %v3730_v11, %v1369_v15  ;;  %3871 = vmatmul.mubr.msk.bf16.gmra.mxu1 %vm281_vm1, %v2432_v14  ;;  %3908 = vmatprep.mubr.msk.bf16.mxu0 %vm281_vm1, %v2757_v39  ;;  %v2741_v39 = vld [vmem:[%s4124_s7 + $0x136] sm:$0xff] }
 0x14e   : > { %v1373_v50 = vadd.f32 %v3696_v45, %v4645_v36  ;;  %v1550_v53 = vpop.f32.mrf.mxu0  ;;  %3874 = vmatprep.mubr.msk.bf16.mxu1 %vm281_vm1, %v2433_v42  ;;  %v2759_v36 = vpack.c.bf16 %v2740_v33, %v2739_v26 }
 0x14f   : > { %v1240_v37 = vpop.f32.mrf.mxu1  ;;  %v4849_v5 = vadd.f32 %v1550_v53, %v1367_v16 }
 0x150   : > { %v1371_v15 = vadd.f32 %v1240_v37, %v4657_v27  ;;  %v3731_v6 = vpop.f32.mrf.mxu0 }
 0x151   : > { %v3697_v25 = vpop.f32.mrf.mxu1  ;;  %v4852_v59 = vadd.f32 %v3731_v6, %v1370_v62  ;;  %v2742_v62 = vld [vmem:[%s4124_s7 + $0x13e] sm:$0xff]  ;;  %s3930_s7 = smul.u32 4608, %s4078_s16  ;;  %s5193_s16 = scalar_lea.sflag [#allocation3], %s161_s29 }
 0x152   : > { %v1374_v41 = vadd.f32 %v3697_v25, %v4662_v40  ;;  %v1553_v31 = vpop.f32.mrf.mxu0  ;;  %v2760_v11 = vpack.c.bf16 %v2742_v62, %v2741_v39 }
 0x153   : > { %v1243_v8 = vpop.f32.mrf.mxu1  ;;  %v4855_v19 = vadd.f32 %v1553_v31, %v1368_v34  ;;  %s5185_s11 = scalar_lea.hbm %s5236_s3, %s3930_s7 }
 0x154   : > { %v1372_v16 = vadd.f32 %v1243_v8, %v4665_v56  ;;  %v3734_v29 = vpop.f32.mrf.mxu0  ;;  %3909 = vmatmul.mubr.msk.bf16.gmra.mxu0 %vm281_vm1, %v2758_v57 }
 0x155   : > { %v3700_v27 = vpop.f32.mrf.mxu1  ;;  %v4859_v14 = vadd.f32 %v3734_v29, %v1373_v50  ;;  %3875 = vmatmul.mubr.msk.bf16.gmra.mxu1 %vm281_vm1, %v2434_v58  ;;  %3912 = vmatprep.mubr.msk.bf16.mxu0 %vm281_vm1, %v2759_v36 }
 0x156   : > { %v1377_v40 = vadd.f32 %v3700_v27, %v4669_v63  ;;  %v1566_v13 = vpop.f32.mrf.mxu0 }
 0x157   : > { %v1256_v42 = vpop.f32.mrf.mxu1  ;;  %v4866_v43 = vadd.f32 %v1566_v13, %v1371_v15 }
 0x158   : > { %v1375_v56 = vadd.f32 %v1256_v42, %v4681_v10  ;;  %v3735_v34 = vpop.f32.mrf.mxu0 }
 0x159   : > { %v3701_v45 = vpop.f32.mrf.mxu1  ;;  %v4869_v20 = vadd.f32 %v3735_v34, %v1374_v41 }
 0x15a   : > { %v1378_v24 = vadd.f32 %v3701_v45, %v4686_v28  ;;  %v1569_v51 = vpop.f32.mrf.mxu0 }
 0x15b   : > { %v1259_v50 = vpop.f32.mrf.mxu1  ;;  %v4872_v53 = vadd.f32 %v1569_v51, %v1372_v16 }
 0x15c   : > { %v1376_v23 = vadd.f32 %v1259_v50, %v4689_v35  ;;  %v3738_v63 = vpop.f32.mrf.mxu0  ;;  %3913 = vmatmul.mubr.msk.bf16.gmra.mxu0 %vm281_vm1, %v2760_v11 }
 0x15d   : > { %v3704_v26 = vpop.f32.mrf.mxu1  ;;  %v4876_v33 = vadd.f32 %v3738_v63, %v1377_v40 }
 0x15e   : > { %v1381_v10 = vadd.f32 %v3704_v26, %v4693_v47  ;;  %v1582_v37 = vpop.f32.mrf.mxu0 }
 0x15f   : > { %v1272_v15 = vpop.f32.mrf.mxu1  ;;  %v4879_v6 = vadd.f32 %v1582_v37, %v1375_v56 }
 0x160   : > { %v1379_v28 = vadd.f32 %v1272_v15, %v4705_v2  ;;  %v3739_v57 = vpop.f32.mrf.mxu0 }
 0x161   : > { %v3705_v25 = vpop.f32.mrf.mxu1  ;;  %v4882_v58 = vadd.f32 %v3739_v57, %v1378_v24 }
 0x162   : > { %v1382_v35 = vadd.f32 %v3705_v25, %v4710_v12  ;;  %v1585_v36 = vpop.f32.mrf.mxu0 }
 0x163   : > { %v1275_v41 = vpop.f32.mrf.mxu1  ;;  %v4885_v31 = vadd.f32 %v1585_v36, %v1376_v23 }
 0x164   : > { %v1380_v8 = vadd.f32 %v1275_v41, %v4713_v52  ;;  %v3742_v16 = vpop.f32.mrf.mxu0 }
 0x165   : > { %v3708_v47 = vpop.f32.mrf.mxu1  ;;  %v4888_v29 = vadd.f32 %v3742_v16, %v1381_v10 }
 0x166   : > { %v1385_v27 = vadd.f32 %v3708_v47, %v4717_v32  ;;  %v1598_v39 = vpop.f32.mrf.mxu0 }
 0x167   : > { %v1288_v2 = vpop.f32.mrf.mxu1  ;;  %v4891_v62 = vadd.f32 %v1598_v39, %v1379_v28 }
 0x168   : > { %v1383_v40 = vadd.f32 %v1288_v2, %v4728_v55  ;;  %v3743_v13 = vpop.f32.mrf.mxu0 }
 0x169   : > { %v3709_v12 = vpop.f32.mrf.mxu1  ;;  %v4894_v42 = vadd.f32 %v3743_v13, %v1382_v35 }
 0x16a   : > { %v1386_v56 = vadd.f32 %v3709_v12, %v4732_v44  ;;  %v1601_v34 = vpop.f32.mrf.mxu0 }
 0x16b   : > { %v1291_v52 = vpop.f32.mrf.mxu1  ;;  %v4897_v11 = vadd.f32 %v1601_v34, %v1380_v8 }
 0x16c   : > { %v1384_v45 = vadd.f32 %v1291_v52, %v4735_v1  ;;  %v3746_v24 = vpop.f32.mrf.mxu0 }
 0x16d   : > { %v3712_v32 = vpop.f32.mrf.mxu1  ;;  %v4900_v51 = vadd.f32 %v3746_v24, %v1385_v27 }
 0x16e   : > { %v1389_v50 = vadd.f32 %v3712_v32, %v4739_v17  ;;  %v1614_v23 = vpop.f32.mrf.mxu0 }
 0x16f   : > { %v1304_v55 = vpop.f32.mrf.mxu1  ;;  %v4903_v63 = vadd.f32 %v1614_v23, %v1383_v40 }
 0x170   : > { %v1387_v26 = vadd.f32 %v1304_v55, %v4751_v9  ;;  %v3747_v10 = vpop.f32.mrf.mxu0 }
 0x171   : > { %v3713_v44 = vpop.f32.mrf.mxu1  ;;  %v4906_v37 = vadd.f32 %v3747_v10, %v1386_v56 }
 0x172   : > { %v1390_v15 = vadd.f32 %v3713_v44, %v4756_v18  ;;  %v1617_v28 = vpop.f32.mrf.mxu0 }
 0x173   : > { %v1307_v1 = vpop.f32.mrf.mxu1  ;;  %v4909_v57 = vadd.f32 %v1617_v28, %v1384_v45 }
 0x174   : > { %v1388_v25 = vadd.f32 %v1307_v1, %v4759_v4  ;;  %v3750_v35 = vpop.f32.mrf.mxu0 }
 0x175   : > { %v3716_v17 = vpop.f32.mrf.mxu1  ;;  %v4912_v36 = vadd.f32 %v3750_v35, %v1389_v50 }
 0x176   : > { %v1393_v41 = vadd.f32 %v3716_v17, %v4763_v49  ;;  %v1630_v8 = vpop.f32.mrf.mxu0 }
 0x177   : > { %v1320_v9 = vpop.f32.mrf.mxu1  ;;  %v4915_v16 = vadd.f32 %v1630_v8, %v1387_v26 }
 0x178   : > { %v1391_v47 = vadd.f32 %v1320_v9, %v4775_v3  ;;  %v3751_v27 = vpop.f32.mrf.mxu0 }
 0x179   : > { %v3717_v18 = vpop.f32.mrf.mxu1  ;;  %v4918_v39 = vadd.f32 %v3751_v27, %v1390_v15 }
 0x17a   : > { %v1394_v2 = vadd.f32 %v3717_v18, %v4780_v46  ;;  %v1633_v40 = vpop.f32.mrf.mxu0 }
 0x17b   : > { %v1323_v4 = vpop.f32.mrf.mxu1  ;;  %v4921_v13 = vadd.f32 %v1633_v40, %v1388_v25 }
 0x17c   : > { %v1392_v12 = vadd.f32 %v1323_v4, %v4783_v0  ;;  %v3754_v56 = vpop.f32.mrf.mxu0 }
 0x17d   : > { %v3720_v49 = vpop.f32.mrf.mxu1  ;;  %v4924_v34 = vadd.f32 %v3754_v56, %v1393_v41 }
 0x17e   : > { %v1397_v52 = vadd.f32 %v3720_v49, %v4787_v61  ;;  %v1646_v45 = vpop.f32.mrf.mxu0 }
 0x17f   : > { %v1336_v3 = vpop.f32.mrf.mxu1  ;;  %v4927_v24 = vadd.f32 %v1646_v45, %v1391_v47 }
 0x180   : > { %v1395_v32 = vadd.f32 %v1336_v3, %v4799_v7  ;;  %v3755_v50 = vpop.f32.mrf.mxu0 }
 0x181   : > { %v3721_v46 = vpop.f32.mrf.mxu1  ;;  %v4930_v23 = vadd.f32 %v3755_v50, %v1394_v2 }
 0x182   : > { %v1398_v55 = vadd.f32 %v3721_v46, %v4804_v48  ;;  %v1649_v26 = vpop.f32.mrf.mxu0 }
 0x183   : > { %v1339_v0 = vpop.f32.mrf.mxu1  ;;  %v4933_v10 = vadd.f32 %v1649_v26, %v1392_v12 }
 0x184   : > { %v1396_v44 = vadd.f32 %v1339_v0, %v4807_v38  ;;  %v3758_v15 = vpop.f32.mrf.mxu0 }
 0x185   : > { %v3724_v61 = vpop.f32.mrf.mxu1  ;;  %v4936_v28 = vadd.f32 %v3758_v15, %v1397_v52 }
 0x186   : > { %v1401_v1 = vadd.f32 %v3724_v61, %v4811_v22  ;;  %v1662_v25 = vpop.f32.mrf.mxu0 }
 0x187   : > { %v1352_v7 = vpop.f32.mrf.mxu1  ;;  %v4939_v35 = vadd.f32 %v1662_v25, %v1395_v32 }
 0x188   : > { %v1399_v17 = vadd.f32 %v1352_v7, %v4824_v21  ;;  %v3759_v41 = vpop.f32.mrf.mxu0 }
 0x189   : > { %v3725_v48 = vpop.f32.mrf.mxu1  ;;  %v4942_v8 = vadd.f32 %v3759_v41, %v1398_v55 }
 0x18a   : > { %v1402_v9 = vadd.f32 %v3725_v48, %v4830_v30  ;;  %v1665_v47 = vpop.f32.mrf.mxu0 }
 0x18b   : > { %v1355_v38 = vpop.f32.mrf.mxu1  ;;  %v4945_v27 = vadd.f32 %v1665_v47, %v1396_v44 }
 0x18c   : > { %v1400_v18 = vadd.f32 %v1355_v38, %v4833_v60  ;;  %v3762_v2 = vpop.f32.mrf.mxu0 }
 0x18d   : > { %v4948_v22 = vadd.f32 %v3762_v2, %v1401_v1  ;;  %v3768_v40 = vpop.f32.mrf.mxu1 }
 0x18e   : > { %v2021_v4 = vadd.f32 %v3768_v40, %v4837_v54  ;;  %v1678_v12 = vpop.f32.mrf.mxu0 }
 0x18f   : > { %v4951_v21 = vadd.f32 %v1678_v12, %v1399_v17  ;;  %v1876_v56 = vpop.f32.mrf.mxu1 }
 0x190   : > { %v2019_v49 = vadd.f32 %v1876_v56, %v4849_v5  ;;  %v3763_v52 = vpop.f32.mrf.mxu0 }
 0x191   : > { %v4954_v30 = vadd.f32 %v3763_v52, %v1402_v9  ;;  %v3769_v45 = vpop.f32.mrf.mxu1 }
 0x192   : > { %v2022_v3 = vadd.f32 %v3769_v45, %v4852_v59  ;;  %v1681_v32 = vpop.f32.mrf.mxu0 }
 0x193   : > { %v4957_v60 = vadd.f32 %v1681_v32, %v1400_v18  ;;  %v1879_v50 = vpop.f32.mrf.mxu1 }
 0x194   : > { %v2020_v46 = vadd.f32 %v1879_v50, %v4855_v19  ;;  %v3806_v55 = vpop.f32.mrf.mxu0 }
 0x195   : > { %v3772_v54 = vpop.f32.mrf.mxu1  ;;  %v4960_v26 = vadd.f32 %v3806_v55, %v2021_v4 }
 0x196   : > { %v2025_v0 = vadd.f32 %v3772_v54, %v4859_v14  ;;  %v2202_v44 = vpop.f32.mrf.mxu0 }
 0x197   : > { %v1892_v5 = vpop.f32.mrf.mxu1  ;;  %v4963_v15 = vadd.f32 %v2202_v44, %v2019_v49 }
 0x198   : > { %v2023_v61 = vadd.f32 %v1892_v5, %v4866_v43  ;;  %v3807_v1 = vpop.f32.mrf.mxu0 }
 0x199   : > { %v3773_v59 = vpop.f32.mrf.mxu1  ;;  %v4966_v25 = vadd.f32 %v3807_v1, %v2022_v3 }
 0x19a   : > { %v2026_v7 = vadd.f32 %v3773_v59, %v4869_v20  ;;  %v2205_v17 = vpop.f32.mrf.mxu0 }
 0x19b   : > { %v1895_v19 = vpop.f32.mrf.mxu1  ;;  %v4969_v41 = vadd.f32 %v2205_v17, %v2020_v46 }
 0x19c   : > { %v2024_v48 = vadd.f32 %v1895_v19, %v4872_v53  ;;  %v3810_v9 = vpop.f32.mrf.mxu0 }
 0x19d   : > { %v3776_v14 = vpop.f32.mrf.mxu1  ;;  %v4972_v47 = vadd.f32 %v3810_v9, %v2025_v0 }
 0x19e   : > { %v2029_v38 = vadd.f32 %v3776_v14, %v4876_v33  ;;  %v2218_v18 = vpop.f32.mrf.mxu0 }
 0x19f   : > { %v1908_v43 = vpop.f32.mrf.mxu1  ;;  %v4975_v2 = vadd.f32 %v2218_v18, %v2023_v61 }
 0x1a0   : > { %v2027_v40 = vadd.f32 %v1908_v43, %v4879_v6  ;;  %v3811_v4 = vpop.f32.mrf.mxu0 }
 0x1a1   : > { %v3777_v20 = vpop.f32.mrf.mxu1  ;;  %v4978_v12 = vadd.f32 %v3811_v4, %v2026_v7 }
 0x1a2   : > { %v2030_v56 = vadd.f32 %v3777_v20, %v4882_v58  ;;  %v2221_v49 = vpop.f32.mrf.mxu0 }
 0x1a3   : > { %v1911_v53 = vpop.f32.mrf.mxu1  ;;  %v4981_v52 = vadd.f32 %v2221_v49, %v2024_v48 }
 0x1a4   : > { %v2028_v45 = vadd.f32 %v1911_v53, %v4885_v31  ;;  %v3814_v3 = vpop.f32.mrf.mxu0 }
 0x1a5   : > { %v3780_v33 = vpop.f32.mrf.mxu1  ;;  %v4984_v32 = vadd.f32 %v3814_v3, %v2029_v38 }
 0x1a6   : > { %v2033_v50 = vadd.f32 %v3780_v33, %v4888_v29  ;;  %v2234_v46 = vpop.f32.mrf.mxu0 }
 0x1a7   : > { %v1924_v6 = vpop.f32.mrf.mxu1  ;;  %v4987_v55 = vadd.f32 %v2234_v46, %v2027_v40 }
 0x1a8   : > { %v2031_v54 = vadd.f32 %v1924_v6, %v4891_v62  ;;  %v3815_v0 = vpop.f32.mrf.mxu0 }
 0x1a9   : > { %v3781_v58 = vpop.f32.mrf.mxu1  ;;  %v4990_v44 = vadd.f32 %v3815_v0, %v2030_v56 }
 0x1aa   : > { %v2034_v5 = vadd.f32 %v3781_v58, %v4894_v42  ;;  %v2237_v61 = vpop.f32.mrf.mxu0 }
 0x1ab   : > { %v1927_v31 = vpop.f32.mrf.mxu1  ;;  %v4993_v1 = vadd.f32 %v2237_v61, %v2028_v45 }
 0x1ac   : > { %v2032_v59 = vadd.f32 %v1927_v31, %v4897_v11  ;;  %v3818_v7 = vpop.f32.mrf.mxu0 }
 0x1ad   : > { %v3784_v29 = vpop.f32.mrf.mxu1  ;;  %v4996_v17 = vadd.f32 %v3818_v7, %v2033_v50 }
 0x1ae   : > { %v2037_v19 = vadd.f32 %v3784_v29, %v4900_v51  ;;  %v2250_v48 = vpop.f32.mrf.mxu0 }
 0x1af   : > { %v1940_v62 = vpop.f32.mrf.mxu1  ;;  %v4999_v9 = vadd.f32 %v2250_v48, %v2031_v54 }
 0x1b0   : > { %v2035_v14 = vadd.f32 %v1940_v62, %v4903_v63  ;;  %v3819_v38 = vpop.f32.mrf.mxu0 }
 0x1b1   : > { %v3785_v42 = vpop.f32.mrf.mxu1  ;;  %v5002_v18 = vadd.f32 %v3819_v38, %v2034_v5 }
 0x1b2   : > { %v2038_v43 = vadd.f32 %v3785_v42, %v4906_v37  ;;  %v2253_v40 = vpop.f32.mrf.mxu0 }
 0x1b3   : > { %v1943_v11 = vpop.f32.mrf.mxu1  ;;  %v5005_v4 = vadd.f32 %v2253_v40, %v2032_v59 }
 0x1b4   : > { %v2036_v20 = vadd.f32 %v1943_v11, %v4909_v57  ;;  %v3822_v56 = vpop.f32.mrf.mxu0 }
 0x1b5   : > { %v3788_v51 = vpop.f32.mrf.mxu1  ;;  %v5008_v49 = vadd.f32 %v3822_v56, %v2037_v19 }
 0x1b6   : > { %v2041_v53 = vadd.f32 %v3788_v51, %v4912_v36  ;;  %v2266_v45 = vpop.f32.mrf.mxu0 }
 0x1b7   : > { %v1956_v63 = vpop.f32.mrf.mxu1  ;;  %v5011_v3 = vadd.f32 %v2266_v45, %v2035_v14 }
 0x1b8   : > { %v2039_v33 = vadd.f32 %v1956_v63, %v4915_v16  ;;  %v3823_v50 = vpop.f32.mrf.mxu0 }
 0x1b9   : > { %v3789_v37 = vpop.f32.mrf.mxu1  ;;  %v5014_v46 = vadd.f32 %v3823_v50, %v2038_v43 }
 0x1ba   : > { %v2042_v6 = vadd.f32 %v3789_v37, %v4918_v39  ;;  %v2269_v54 = vpop.f32.mrf.mxu0 }
 0x1bb   : > { %v1959_v57 = vpop.f32.mrf.mxu1  ;;  %v5017_v0 = vadd.f32 %v2269_v54, %v2036_v20 }
 0x1bc   : > { %v2040_v58 = vadd.f32 %v1959_v57, %v4921_v13  ;;  %v3826_v5 = vpop.f32.mrf.mxu0 }
 0x1bd   : > { %v3792_v36 = vpop.f32.mrf.mxu1  ;;  %v5020_v61 = vadd.f32 %v3826_v5, %v2041_v53 }
 0x1be   : > { %v2045_v31 = vadd.f32 %v3792_v36, %v4924_v34  ;;  %v2282_v59 = vpop.f32.mrf.mxu0 }
 0x1bf   : > { %v1972_v16 = vpop.f32.mrf.mxu1  ;;  %v5023_v7 = vadd.f32 %v2282_v59, %v2039_v33 }
 0x1c0   : > { %v2043_v29 = vadd.f32 %v1972_v16, %v4927_v24  ;;  %v3827_v19 = vpop.f32.mrf.mxu0 }
 0x1c1   : > { %v3793_v39 = vpop.f32.mrf.mxu1  ;;  %v5026_v48 = vadd.f32 %v3827_v19, %v2042_v6 }
 0x1c2   : > { %v2046_v62 = vadd.f32 %v3793_v39, %v4930_v23  ;;  %v2285_v14 = vpop.f32.mrf.mxu0 }
 0x1c3   : > { %v1975_v13 = vpop.f32.mrf.mxu1  ;;  %v5029_v38 = vadd.f32 %v2285_v14, %v2040_v58 }
 0x1c4   : > { %v2044_v42 = vadd.f32 %v1975_v13, %v4933_v10  ;;  %v3830_v43 = vpop.f32.mrf.mxu0 }
 0x1c5   : > { %v3796_v34 = vpop.f32.mrf.mxu1  ;;  %v5032_v40 = vadd.f32 %v3830_v43, %v2045_v31 }
 0x1c6   : > { %v2049_v11 = vadd.f32 %v3796_v34, %v4936_v28  ;;  %v2298_v20 = vpop.f32.mrf.mxu0 }
 0x1c7   : > { %v1988_v24 = vpop.f32.mrf.mxu1  ;;  %v5035_v56 = vadd.f32 %v2298_v20, %v2043_v29 }
 0x1c8   : > { %v2047_v51 = vadd.f32 %v1988_v24, %v4939_v35  ;;  %v3831_v53 = vpop.f32.mrf.mxu0 }
 0x1c9   : > { %v3797_v23 = vpop.f32.mrf.mxu1  ;;  %v5038_v45 = vadd.f32 %v3831_v53, %v2046_v62  ;;  %v5071_v53 = vld [vmem:[%s5235_s2] ss:$0 sm:$0xff] }
 0x1ca   : > { %v2050_v63 = vadd.f32 %v3797_v23, %v4942_v8  ;;  %v2301_v33 = vpop.f32.mrf.mxu0 }
 0x1cb   : > { %v1991_v10 = vpop.f32.mrf.mxu1  ;;  %v5041_v50 = vadd.f32 %v2301_v33, %v2044_v42 }
 0x1cc   : > { %v2048_v37 = vadd.f32 %v1991_v10, %v4945_v27  ;;  %v3834_v6 = vpop.f32.mrf.mxu0 }
 0x1cd   : > { %v3800_v28 = vpop.f32.mrf.mxu1  ;;  %v5044_v54 = vadd.f32 %v3834_v6, %v2049_v11 }
 0x1ce   : > { %v2053_v57 = vadd.f32 %v3800_v28, %v4948_v22  ;;  %v2314_v58 = vpop.f32.mrf.mxu0 }
 0x1cf   : > { %v2004_v35 = vpop.f32.mrf.mxu1  ;;  %v5047_v5 = vadd.f32 %v2314_v58, %v2047_v51 }
 0x1d0   : > { %v2051_v36 = vadd.f32 %v2004_v35, %v4951_v21  ;;  %v3835_v31 = vpop.f32.mrf.mxu0 }
 0x1d1   : > { %v3801_v8 = vpop.f32.mrf.mxu1  ;;  %v5050_v59 = vadd.f32 %v3835_v31, %v2050_v63 }
 0x1d2   : > { %v2054_v16 = vadd.f32 %v3801_v8, %v4954_v30  ;;  %v2317_v27 = vpop.f32.mrf.mxu0 }
 0x1d3   : > { %v2007_v29 = vpop.f32.mrf.mxu1  ;;  %v5053_v19 = vadd.f32 %v2317_v27, %v2048_v37 }
 0x1d4   : > { %v2052_v22 = vadd.f32 %v2007_v29, %v4957_v60  ;;  %v3838_v39 = vpop.f32.mrf.mxu0 }
 0x1d5   : > { %v5056_v62 = vadd.f32 %v3838_v39, %v2053_v57  ;;  %v3844_v14 = vpop.f32.mrf.mxu1 }
 0x1d6   : > { %v2330_v13 = vpop.f32.mrf.mxu0  ;;  %v2673_v20 = vadd.f32 %v3844_v14, %v4960_v26 }
 0x1d7   : > { %v5058_v21 = vadd.f32 %v2330_v13, %v2051_v36  ;;  %v2528_v42 = vpop.f32.mrf.mxu1 }
 0x1d8   : > { %v3839_v43 = vpop.f32.mrf.mxu0  ;;  %v2671_v23 = vadd.f32 %v2528_v42, %v4963_v15 }
 0x1d9   : > { %v5060_v34 = vadd.f32 %v3839_v43, %v2054_v16  ;;  %v3845_v11 = vpop.f32.mrf.mxu1 }
 0x1da   : > { %v2333_v30 = vpop.f32.mrf.mxu0  ;;  %v2674_v37 = vadd.f32 %v3845_v11, %v4966_v25 }
 0x1db   : > { %v5064_v24 = vadd.f32 %v2333_v30, %v2052_v22  ;;  %v2531_v51 = vpop.f32.mrf.mxu1 }
 0x1dc   : > { %v3882_v60 = vpop.f32.mrf.mxu0  ;;  %v2672_v58 = vadd.f32 %v2531_v51, %v4969_v41 }
 0x1dd   : > { %v3848_v63 = vpop.f32.mrf.mxu1  ;;  %v2999_v33 = vadd.f32 %v3882_v60, %v2673_v20 }
 0x1de   : > { %v2854_v10 = vpop.f32.mrf.mxu0  ;;  %v2677_v15 = vadd.f32 %v3848_v63, %v4972_v47 }
 0x1df   : > { %v3042_v26 = vadd.f32 %v5071_v53, %v2999_v33  ;;  %v2544_v6 = vpop.f32.mrf.mxu1  ;;  %v2997_v28 = vadd.f32 %v2854_v10, %v2671_v23 }
 0x1e0   : > { %v3883_v57 = vpop.f32.mrf.mxu0  ;;  %v2675_v39 = vadd.f32 %v2544_v6, %v4975_v2 }
 0x1e1   : > { %v3078_v35 = vmax.f32 %v3042_v26, 0.0  ;;  %v3040_v36 = vadd.f32 %v5071_v53, %v2997_v28  ;;  %v3849_v31 = vpop.f32.mrf.mxu1  ;;  %v3000_v8 = vadd.f32 %v3883_v57, %v2674_v37 }
 0x1e2   : > { %v2857_v16 = vpop.f32.mrf.mxu0  ;;  %v2678_v11 = vadd.f32 %v3849_v31, %v4978_v12 }
 0x1e3   : > { %3114 = vst [vmem:[%s5079_s6 + $0x10] sm:$0xff] %v3078_v35  ;;  %v3076_v25 = vmax.f32 %v3040_v36, 0.0  ;;  %v3043_v27 = vadd.f32 %v5071_v53, %v3000_v8  ;;  %v2547_v29 = vpop.f32.mrf.mxu1  ;;  %v2998_v22 = vadd.f32 %v2857_v16, %v2672_v58 }
 0x1e4   : > { %v3886_v41 = vpop.f32.mrf.mxu0  ;;  %v2676_v2 = vadd.f32 %v2547_v29, %v4981_v52 }
 0x1e5   : > { %3112 = vst [vmem:[%s5079_s6] sm:$0xff] %v3076_v25  ;;  %v3079_v14 = vmax.f32 %v3043_v27, 0.0  ;;  %v3041_v13 = vadd.f32 %v5071_v53, %v2998_v22  ;;  %v3852_v47 = vpop.f32.mrf.mxu1  ;;  %v3003_v42 = vadd.f32 %v3886_v41, %v2677_v15 }
 0x1e6   : > { %v2870_v43 = vpop.f32.mrf.mxu0  ;;  %v2681_v12 = vadd.f32 %v3852_v47, %v4984_v32 }
 0x1e7   : > { %3115 = vst [vmem:[%s5079_s6 + $0x18] sm:$0xff] %v3079_v14  ;;  %v3077_v30 = vmax.f32 %v3041_v13, 0.0  ;;  %v3046_v20 = vadd.f32 %v5071_v53, %v3003_v42  ;;  %v2560_v51 = vpop.f32.mrf.mxu1  ;;  %v3001_v60 = vadd.f32 %v2870_v43, %v2675_v39 }
 0x1e8   : > { %v3887_v23 = vpop.f32.mrf.mxu0  ;;  %v2679_v52 = vadd.f32 %v2560_v51, %v4987_v55 }
 0x1e9   : > { %3113 = vst [vmem:[%s5079_s6 + $0x8] sm:$0xff] %v3077_v30  ;;  %v3082_v63 = vmax.f32 %v3046_v20, 0.0  ;;  %v3044_v33 = vadd.f32 %v5071_v53, %v3001_v60  ;;  %v3853_v10 = vpop.f32.mrf.mxu1  ;;  %v3004_v37 = vadd.f32 %v3887_v23, %v2678_v11 }
 0x1ea   : > { %v2873_v26 = vpop.f32.mrf.mxu0  ;;  %v2682_v32 = vadd.f32 %v3853_v10, %v4990_v44 }
 0x1eb   : > { %3118 = vst [vmem:[%s5079_s6 + $0x30] sm:$0xff] %v3082_v63  ;;  %v3080_v6 = vmax.f32 %v3044_v33, 0.0  ;;  %v3047_v28 = vadd.f32 %v5071_v53, %v3004_v37  ;;  %v2563_v57 = vpop.f32.mrf.mxu1  ;;  %v3002_v58 = vadd.f32 %v2873_v26, %v2676_v2 }
 0x1ec   : > { %v3890_v35 = vpop.f32.mrf.mxu0  ;;  %v2680_v55 = vadd.f32 %v2563_v57, %v4993_v1 }
 0x1ed   : > { %3116 = vst [vmem:[%s5079_s6 + $0x20] sm:$0xff] %v3080_v6  ;;  %v3083_v36 = vmax.f32 %v3047_v28, 0.0  ;;  %v3045_v31 = vadd.f32 %v5071_v53, %v3002_v58  ;;  %v3856_v8 = vpop.f32.mrf.mxu1  ;;  %v3007_v16 = vadd.f32 %v3890_v35, %v2681_v12 }
 0x1ee   : > { %v2886_v15 = vpop.f32.mrf.mxu0  ;;  %v2685_v44 = vadd.f32 %v3856_v8, %v4996_v17 }
 0x1ef   : > { %3119 = vst [vmem:[%s5079_s6 + $0x38] sm:$0xff] %v3083_v36  ;;  %v3081_v25 = vmax.f32 %v3045_v31, 0.0  ;;  %v3050_v27 = vadd.f32 %v5071_v53, %v3007_v16  ;;  %v2576_v29 = vpop.f32.mrf.mxu1  ;;  %v3005_v22 = vadd.f32 %v2886_v15, %v2679_v52 }
 0x1f0   : > { %v3891_v41 = vpop.f32.mrf.mxu0  ;;  %v2683_v1 = vadd.f32 %v2576_v29, %v4999_v9 }
 0x1f1   : > { %3117 = vst [vmem:[%s5079_s6 + $0x28] sm:$0xff] %v3081_v25  ;;  %v3086_v39 = vmax.f32 %v3050_v27, 0.0  ;;  %v3048_v14 = vadd.f32 %v5071_v53, %v3005_v22  ;;  %v3857_v13 = vpop.f32.mrf.mxu1  ;;  %v3008_v47 = vadd.f32 %v3891_v41, %v2682_v32 }
 0x1f2   : > { %v2889_v42 = vpop.f32.mrf.mxu0  ;;  %v2686_v17 = vadd.f32 %v3857_v13, %v5002_v18 }
 0x1f3   : > { %3122 = vst [vmem:[%s5079_s6 + $0x50] sm:$0xff] %v3086_v39  ;;  %v3084_v43 = vmax.f32 %v3048_v14, 0.0  ;;  %v3051_v11 = vadd.f32 %v5071_v53, %v3008_v47  ;;  %v2579_v30 = vpop.f32.mrf.mxu1  ;;  %v3006_v20 = vadd.f32 %v2889_v42, %v2680_v55 }
 0x1f4   : > { %v3894_v51 = vpop.f32.mrf.mxu0  ;;  %v2684_v9 = vadd.f32 %v2579_v30, %v5005_v4 }
 0x1f5   : > { %3120 = vst [vmem:[%s5079_s6 + $0x40] sm:$0xff] %v3084_v43  ;;  %v3087_v60 = vmax.f32 %v3051_v11, 0.0  ;;  %v3049_v23 = vadd.f32 %v5071_v53, %v3006_v20  ;;  %v3860_v2 = vpop.f32.mrf.mxu1  ;;  %v3011_v63 = vadd.f32 %v3894_v51, %v2685_v44 }
 0x1f6   : > { %v2902_v33 = vpop.f32.mrf.mxu0  ;;  %v2689_v18 = vadd.f32 %v3860_v2, %v5008_v49 }
 0x1f7   : > { %3123 = vst [vmem:[%s5079_s6 + $0x58] sm:$0xff] %v3087_v60  ;;  %v3085_v10 = vmax.f32 %v3049_v23, 0.0  ;;  %v3054_v37 = vadd.f32 %v5071_v53, %v3011_v63  ;;  %v2592_v26 = vpop.f32.mrf.mxu1  ;;  %v3009_v12 = vadd.f32 %v2902_v33, %v2683_v1 }
 0x1f8   : > { %v3895_v6 = vpop.f32.mrf.mxu0  ;;  %v2687_v4 = vadd.f32 %v2592_v26, %v5011_v3 }
 0x1f9   : > { %3121 = vst [vmem:[%s5079_s6 + $0x48] sm:$0xff] %v3085_v10  ;;  %v3090_v28 = vmax.f32 %v3054_v37, 0.0  ;;  %v3052_v57 = vadd.f32 %v5071_v53, %v3009_v12  ;;  %v3861_v58 = vpop.f32.mrf.mxu1  ;;  %v3012_v35 = vadd.f32 %v3895_v6, %v2686_v17 }
 0x1fa   : > { %v2905_v52 = vpop.f32.mrf.mxu0  ;;  %v2690_v49 = vadd.f32 %v3861_v58, %v5014_v46 }
 0x1fb   : > { %3126 = vst [vmem:[%s5079_s6 + $0x70] sm:$0xff] %v3090_v28  ;;  %v3088_v36 = vmax.f32 %v3052_v57, 0.0  ;;  %v3055_v31 = vadd.f32 %v5071_v53, %v3012_v35  ;;  %v2595_v8 = vpop.f32.mrf.mxu1  ;;  %v3010_v16 = vadd.f32 %v2905_v52, %v2684_v9 }
 0x1fc   : > { %v3898_v15 = vpop.f32.mrf.mxu0  ;;  %v2688_v3 = vadd.f32 %v2595_v8, %v5017_v0 }
 0x1fd   : > { %3124 = vst [vmem:[%s5079_s6 + $0x60] sm:$0xff] %v3088_v36  ;;  %v3091_v32 = vmax.f32 %v3055_v31, 0.0  ;;  %v3053_v25 = vadd.f32 %v5071_v53, %v3010_v16  ;;  %v3864_v27 = vpop.f32.mrf.mxu1  ;;  %v3015_v29 = vadd.f32 %v3898_v15, %v2689_v18 }
 0x1fe   : > { %v2918_v22 = vpop.f32.mrf.mxu0  ;;  %v2693_v46 = vadd.f32 %v3864_v27, %v5020_v61 }
 0x1ff   : > { %3127 = vst [vmem:[%s5079_s6 + $0x78] sm:$0xff] %v3091_v32  ;;  %v3089_v41 = vmax.f32 %v3053_v25, 0.0  ;;  %v3058_v55 = vadd.f32 %v5071_v53, %v3015_v29  ;;  %v2608_v39 = vpop.f32.mrf.mxu1  ;;  %v3013_v14 = vadd.f32 %v2918_v22, %v2687_v4 }
 0x200   : > { %v3899_v13 = vpop.f32.mrf.mxu0  ;;  %v2691_v0 = vadd.f32 %v2608_v39, %v5023_v7 }
 0x201   : > { %3125 = vst [vmem:[%s5079_s6 + $0x68] sm:$0xff] %v3089_v41  ;;  %v3094_v47 = vmax.f32 %v3058_v55, 0.0  ;;  %v3056_v42 = vadd.f32 %v5071_v53, %v3013_v14  ;;  %v3865_v44 = vpop.f32.mrf.mxu1  ;;  %v3016_v43 = vadd.f32 %v3899_v13, %v2690_v49 }
 0x202   : > { %v2921_v11 = vpop.f32.mrf.mxu0  ;;  %v2694_v61 = vadd.f32 %v3865_v44, %v5026_v48 }
 0x203   : > { %3130 = vst [vmem:[%s5079_s6 + $0x90] sm:$0xff] %v3094_v47  ;;  %v3092_v30 = vmax.f32 %v3056_v42, 0.0  ;;  %v3059_v20 = vadd.f32 %v5071_v53, %v3016_v43  ;;  %v2611_v51 = vpop.f32.mrf.mxu1  ;;  %v3014_v1 = vadd.f32 %v2921_v11, %v2688_v3 }
 0x204   : > { %v3902_v60 = vpop.f32.mrf.mxu0  ;;  %v2692_v7 = vadd.f32 %v2611_v51, %v5029_v38 }
 0x205   : > { %3128 = vst [vmem:[%s5079_s6 + $0x80] sm:$0xff] %v3092_v30  ;;  %v3095_v23 = vmax.f32 %v3059_v20, 0.0  ;;  %v3057_v2 = vadd.f32 %v5071_v53, %v3014_v1  ;;  %v3868_v63 = vpop.f32.mrf.mxu1  ;;  %v3019_v33 = vadd.f32 %v3902_v60, %v2693_v46 }
 0x206   : > { %v2934_v17 = vpop.f32.mrf.mxu0  ;;  %v2697_v48 = vadd.f32 %v3868_v63, %v5032_v40 }
 0x207   : > { %3131 = vst [vmem:[%s5079_s6 + $0x98] sm:$0xff] %v3095_v23  ;;  %v3093_v10 = vmax.f32 %v3057_v2, 0.0  ;;  %v3062_v37 = vadd.f32 %v5071_v53, %v3019_v33  ;;  %v2624_v26 = vpop.f32.mrf.mxu1  ;;  %v3017_v12 = vadd.f32 %v2934_v17, %v2691_v0 }
 0x208   : > { %v3903_v6 = vpop.f32.mrf.mxu0  ;;  %v2695_v38 = vadd.f32 %v2624_v26, %v5035_v56 }
 0x209   : > { %3129 = vst [vmem:[%s5079_s6 + $0x88] sm:$0xff] %v3093_v10  ;;  %v3098_v9 = vmax.f32 %v3062_v37, 0.0  ;;  %v3060_v28 = vadd.f32 %v5071_v53, %v3017_v12  ;;  %v3869_v57 = vpop.f32.mrf.mxu1  ;;  %v3020_v58 = vadd.f32 %v3903_v6, %v2694_v61 }
 0x20a   : > { %v2937_v35 = vpop.f32.mrf.mxu0  ;;  %v2698_v40 = vadd.f32 %v3869_v57, %v5038_v45 }
 0x20b   : > { %3134 = vst [vmem:[%s5079_s6 + $0xb0] sm:$0xff] %v3098_v9  ;;  %v3096_v52 = vmax.f32 %v3060_v28, 0.0  ;;  %v3063_v18 = vadd.f32 %v5071_v53, %v3020_v58  ;;  %v2627_v36 = vpop.f32.mrf.mxu1  ;;  %v3018_v31 = vadd.f32 %v2937_v35, %v2692_v7 }
 0x20c   : > { %v3906_v8 = vpop.f32.mrf.mxu0  ;;  %v2696_v56 = vadd.f32 %v2627_v36, %v5041_v50 }
 0x20d   : > { %3132 = vst [vmem:[%s5079_s6 + $0xa0] sm:$0xff] %v3096_v52  ;;  %v3099_v16 = vmax.f32 %v3063_v18, 0.0  ;;  %v3061_v15 = vadd.f32 %v5071_v53, %v3018_v31  ;;  %v3872_v4 = vpop.f32.mrf.mxu1  ;;  %v3023_v32 = vadd.f32 %v3906_v8, %v2697_v48 }
 0x20e   : > { %v2950_v25 = vpop.f32.mrf.mxu0  ;;  %v2701_v45 = vadd.f32 %v3872_v4, %v5044_v54 }
 0x20f   : > { %3135 = vst [vmem:[%s5079_s6 + $0xb8] sm:$0xff] %v3099_v16  ;;  %v3097_v27 = vmax.f32 %v3061_v15, 0.0  ;;  %v3066_v29 = vadd.f32 %v5071_v53, %v3023_v32  ;;  %v2640_v22 = vpop.f32.mrf.mxu1  ;;  %v3021_v49 = vadd.f32 %v2950_v25, %v2695_v38 }
 0x210   : > { %v3907_v41 = vpop.f32.mrf.mxu0  ;;  %v2699_v50 = vadd.f32 %v2640_v22, %v5047_v5 }
 0x211   : > { %3133 = vst [vmem:[%s5079_s6 + $0xa8] sm:$0xff] %v3097_v27  ;;  %v3102_v55 = vmax.f32 %v3066_v29, 0.0  ;;  %v3064_v39 = vadd.f32 %v5071_v53, %v3021_v49  ;;  %v3873_v14 = vpop.f32.mrf.mxu1  ;;  %v3024_v13 = vadd.f32 %v3907_v41, %v2698_v40 }
 0x212   : > { %v2953_v3 = vpop.f32.mrf.mxu0  ;;  %v2702_v54 = vadd.f32 %v3873_v14, %v5050_v59 }
 0x213   : > { %3138 = vst [vmem:[%s5079_s6 + $0xd0] sm:$0xff] %v3102_v55  ;;  %v3100_v47 = vmax.f32 %v3064_v39, 0.0  ;;  %v3067_v42 = vadd.f32 %v5071_v53, %v3024_v13  ;;  %v2643_v44 = vpop.f32.mrf.mxu1  ;;  %v3022_v43 = vadd.f32 %v2953_v3, %v2696_v56 }
 0x214   : > { %v3910_v11 = vpop.f32.mrf.mxu0  ;;  %v2700_v5 = vadd.f32 %v2643_v44, %v5053_v19 }
 0x215   : > { %3136 = vst [vmem:[%s5079_s6 + $0xc0] sm:$0xff] %v3100_v47  ;;  %v3103_v46 = vmax.f32 %v3067_v42, 0.0  ;;  %v3065_v30 = vadd.f32 %v5071_v53, %v3022_v43  ;;  %v3876_v20 = vpop.f32.mrf.mxu1  ;;  %v3027_v51 = vadd.f32 %v3910_v11, %v2701_v45 }
 0x216   : > { %v2966_v1 = vpop.f32.mrf.mxu0  ;;  %v2705_v59 = vadd.f32 %v3876_v20, %v5056_v62 }
 0x217   : > { %3139 = vst [vmem:[%s5079_s6 + $0xd8] sm:$0xff] %v3103_v46  ;;  %v3101_v60 = vmax.f32 %v3065_v30, 0.0  ;;  %v3070_v0 = vadd.f32 %v5071_v53, %v3027_v51  ;;  %v2656_v23 = vpop.f32.mrf.mxu1  ;;  %v3025_v2 = vadd.f32 %v2966_v1, %v2699_v50 }
 0x218   : > { %v3911_v63 = vpop.f32.mrf.mxu0  ;;  %v2703_v9 = vadd.f32 %v2656_v23, %v5058_v21 }
 0x219   : > { %3137 = vst [vmem:[%s5079_s6 + $0xc8] sm:$0xff] %v3101_v60  ;;  %v3106_v33 = vmax.f32 %v3070_v0, 0.0  ;;  %v3068_v17 = vadd.f32 %v5071_v53, %v3025_v2  ;;  %v3028_v61 = vadd.f32 %v3911_v63, %v2702_v54  ;;  %v3877_v10 = vpop.f32.mrf.mxu1 }
 0x21a   : > { %v2969_v37 = vpop.f32.mrf.mxu0  ;;  %v2706_v62 = vadd.f32 %v3877_v10, %v5060_v34 }
 0x21b   : > { %3142 = vst [vmem:[%s5079_s6 + $0xf0] sm:$0xff] %v3106_v33  ;;  %v3104_v26 = vmax.f32 %v3068_v17, 0.0  ;;  %v3071_v12 = vadd.f32 %v5071_v53, %v3028_v61  ;;  %v3026_v6 = vadd.f32 %v2969_v37, %v2700_v5  ;;  %v2659_v58 = vpop.f32.mrf.mxu1 }
 0x21c   : > { %v3914_v7 = vpop.f32.mrf.mxu0  ;;  %v2704_v21 = vadd.f32 %v2659_v58, %v5064_v24 }
 0x21d   : > { %3140 = vst [vmem:[%s5079_s6 + $0xe0] sm:$0xff] %v3104_v26  ;;  %v3107_v19 = vmax.f32 %v3071_v12, 0.0  ;;  %v3069_v28 = vadd.f32 %v5071_v53, %v3026_v6  ;;  %v3031_v57 = vadd.f32 %v3914_v7, %v2705_v59 }
 0x21e   : > { %v2982_v35 = vpop.f32.mrf.mxu0 }
 0x21f   : > { %3143 = vst [vmem:[%s5079_s6 + $0xf8] sm:$0xff] %v3107_v19  ;;  %v3105_v48 = vmax.f32 %v3069_v28, 0.0  ;;  %v3074_v52 = vadd.f32 %v5071_v53, %v3031_v57  ;;  %v3029_v18 = vadd.f32 %v2982_v35, %v2703_v9 }
 0x220   : > { %v3915_v36 = vpop.f32.mrf.mxu0 }
 0x221   : > { %3141 = vst [vmem:[%s5079_s6 + $0xe8] sm:$0xff] %v3105_v48  ;;  %v3110_v31 = vmax.f32 %v3074_v52, 0.0  ;;  %v3072_v8 = vadd.f32 %v5071_v53, %v3029_v18  ;;  %v3032_v38 = vadd.f32 %v3915_v36, %v2706_v62 }
 0x222   : > { %v2985_v16 = vpop.f32.mrf.mxu0 }
 0x223   : > { %3146 = vst [vmem:[%s5079_s6 + $0x110] sm:$0xff] %v3110_v31  ;;  %v3108_v34 = vmax.f32 %v3072_v8, 0.0  ;;  %v3075_v15 = vadd.f32 %v5071_v53, %v3032_v38  ;;  %v3030_v4 = vadd.f32 %v2985_v16, %v2704_v21 }
 0x225   : > { %3144 = vst [vmem:[%s5079_s6 + $0x100] sm:$0xff] %v3108_v34  ;;  %v3111_v32 = vmax.f32 %v3075_v15, 0.0  ;;  %v3073_v24 = vadd.f32 %v5071_v53, %v3030_v4 }
 0x227   : > { %3147 = vst [vmem:[%s5079_s6 + $0x118] sm:$0xff] %v3111_v32  ;;  %v3109_v25 = vmax.f32 %v3073_v24, 0.0 }
 0x229   : > { %3145 = vst [vmem:[%s5079_s6 + $0x108] sm:$0xff] %v3109_v25 }
 0x22a   : > { %3985 = shalt.err (!%p3982_p3)
}
 0x22b   : > { %s3986_s25 = scalar_lea.hbm %s5185_s11, 4608  ;;  %s3990_s28 = scalar_lea.hbm %s5236_s3, 9216 }
 0x22c   : > { %p3987_p4 = scmp.ne.s32.totalorder %s5185_s11, %s3986_s25  ;;  %p3991_p9 = scmp.lt.s32.totalorder %s5185_s11, %s5236_s3 }
 0x22d   : > { %p3992_p10 = scmp.lt.s32.totalorder %s3990_s28, %s3986_s25 }
 0x22e   : > { %p3988_p7 = pnand %p3987_p4, %p4095_p5 }
 0x22f   : > { %p3993_p11 = por %p3992_p10, %p3991_p9 }
 0x230   : > { %p3989_p8 = pneg %p3988_p7 }
 0x232   : > { %p3994_p12 = pnand %p3993_p11, %p3989_p8 }
 0x234   : > { %3997 = shalt.err (!%p3994_p12)
}
 0x235   : > { %s4035_s4 = smov 128   ;;  %s4036_s5 = smov 8  }
 0x236   : > { %3931 = dma.vmem_to_hbm [thread:$0]  (%p4095_p5), %s5187_s8, 4608, %s5185_s11, %s5193_s16, %s4035_s4, %s4035_s4, %s4036_s5  }
 0x237 PF: > { %p3937_p13 = scmp.ge.s32.totalorder %s4032_s15, 2  ;;  %s3177_s6 = sand.u32 1, %s4020_s12  }
 0x238   : > { %s3178_s7 = scalar_lea.sflag [#allocation3], %s3177_s6 }
 0x239   : > { %p3934_p0 = pnand %p3937_p13, %p4099_p6 }
 0x23b   : > { %p3935_p1 = pneg %p3934_p0 }
 0x23d   : > { %4015 = dma.done.wait (%p3935_p1), %s3178_s7, 4608  }
 0x23e   : > { %4017 = vsyncadd (%p3935_p1), %s3178_s7, 4294962688  ;;  %p13_p2 = scmp.ge.s32.totalorder %s4082_s18, 4   ;;  %s5239_s12 = smov %s4024_s13 }
 0x23f   : > { %s5240_s13 = smov %s4028_s14  ;;  %s5241_s14 = smov %s4093_s21 }
 0x240   : > { %s5242_s15 = smov %s4082_s18  ;;  %15 = sbr.rel (!%p13_p2) target bundleno = 3 (0x3), region = 75 }
 0x245   :  { %3183 = vsyncpa [#allocation3], 1 }
 0x246   :  { %3185 = vsyncpa [#allocation3 + $0x1], 1 }

</bundles_post_ra>
